<compile_context>
chip_gen: v7x
topology: tpu7x:2x2x1
jax: 0.10.0
libtpu: 0.0.40
codegen_flags: <defaults>
</compile_context>

<pallas_src>
import functools

import jax
import jax.numpy as jnp
from jax.experimental import pallas as pl
from jax.experimental.pallas import tpu as pltpu

_INV_SQRT2 = 0.7071067811865476
_LN_EPS = 1e-5


def _convnext_kernel(x_ref, pix_ref, dwt_ref, b1_ref, gA_ref, w2_ref, b2_ref,
                     w3_ref, b3_ref, o_ref, *, taps, img_h, img_w, c_per_sample):
    xv = x_ref[...]                                   # (TBC, HW) f32, dense sublanes
    hw = xv.shape[1]

    # ---- boundary masks from the precomputed pixel row/col index planes -----
    hh = pix_ref[0:1, :]                              # (1, HW) int32
    ww = pix_ref[1:2, :]                              # (1, HW) int32
    row_f, col_f = {}, {}
    for dh in sorted({t[0] for t in taps}):
        if dh == 0:
            row_f[dh] = None
        elif dh > 0:
            row_f[dh] = (hh < (img_h - dh)).astype(jnp.float32)
        else:
            row_f[dh] = (hh >= (-dh)).astype(jnp.float32)
    for dw in sorted({t[1] for t in taps}):
        if dw == 0:
            col_f[dw] = None
        elif dw > 0:
            col_f[dw] = (ww < (img_w - dw)).astype(jnp.float32)
        else:
            col_f[dw] = (ww >= (-dw)).astype(jnp.float32)
    tap_masks = []
    for (dh, dw, _s) in taps:
        r, cmask = row_f[dh], col_f[dw]
        if r is None and cmask is None:
            tap_masks.append(None)
        elif r is None:
            tap_masks.append(cmask)
        elif cmask is None:
            tap_masks.append(r)
        else:
            tap_masks.append(r * cmask)               # (1, HW) f32

    # ---- depthwise KxK conv: lane rolls (XLU) + per-row tap columns (VPU) ---
    # The circular wrap of the roll is always zeroed by the boundary mask.
    parts = [None, None, None]
    for t, (dh, dw, s) in enumerate(taps):
        coeff = dwt_ref[t]                            # (TBC, 1) per-row tap weight
        v = xv if s == 0 else pltpu.roll(xv, shift=(-s) % hw, axis=1)
        term = v * coeff
        m = tap_masks[t]
        if m is not None:
            term = term * m                           # (1,HW) broadcast over sublanes
        j = t % 3
        parts[j] = term if parts[j] is None else parts[j] + term
    g = parts[0]
    for p_ in parts[1:]:
        if p_ is not None:
            g = g + p_
    g = g + b1_ref[...]                               # (TBC,1) bias column

    # ---- per-sample LayerNorm over (C,H,W): two-pass via block-diag sums ----
    inv_n = 1.0 / float(c_per_sample * img_h * img_w)
    gA = gA_ref[...]                                  # (TBC, TBC) block-diag of ones
    grp = jnp.dot(gA, g, preferred_element_type=jnp.float32)
    mu = jnp.sum(grp, axis=1, keepdims=True) * inv_n              # per-sample mean
    gc = g - mu
    grp2 = jnp.dot(gA, gc * gc, preferred_element_type=jnp.float32)
    var = jnp.sum(grp2, axis=1, keepdims=True) * inv_n            # centred variance
    ghat = gc * jax.lax.rsqrt(var + _LN_EPS)

    # ---- 1x1 expand (C->4C), exact GELU, 1x1 project (4C->C): block-diag MXU -
    h1 = jnp.dot(w2_ref[...], ghat, preferred_element_type=jnp.float32) + b2_ref[...]
    h1 = 0.5 * h1 * (1.0 + jax.lax.erf(h1 * _INV_SQRT2))          # exact GELU
    h2 = jnp.dot(w3_ref[...], h1, preferred_element_type=jnp.float32) + b3_ref[...]

    # ---- residual straight from the already-loaded input tile ---------------
    o_ref[...] = h2 + xv


def _pick_tile_b(B, c, hw, kk, budget_bytes, min_grid):
    """Largest divisor of B whose per-step VMEM working set fits the budget."""
    def est(tb):
        tbc, tbc4 = tb * c, tb * 4 * c
        plane, plane4 = tbc * hw * 4, tbc4 * hw * 4
        acts = 4 * plane + 3 * plane + plane4 + plane          # dbl-buf io + temps
        consts = 2 * 4 * (kk * tbc * 128 + tbc * tbc + tbc4 * tbc
                          + tbc * tbc4 + 2 * tbc * 128 + tbc4 * 128 + 2 * hw)
        return acts + consts

    divs = [d for d in range(1, B + 1) if B % d == 0]
    ok = [d for d in divs if (d * c) % 8 == 0 or d == B] or divs
    cands = [d for d in ok if est(d) <= budget_bytes and B // d >= min_grid]
    if not cands:
        cands = [d for d in ok if est(d) <= budget_bytes]
    if not cands:
        cands = [min(ok)]
    return max(cands)


def sequence_res_convnext_block(x, params, k1, *, tile_b=None,
                                vmem_budget_bytes=10 * 1024 * 1024,
                                min_grid_steps=2,
                                vmem_limit_bytes=32 * 1024 * 1024):
    """x: (b_len, n, C, H, W) float32. params: (w1, b1, w2, b2, w3, b3)."""
    b_len, n, c, h, w = x.shape
    B = b_len * n
    hw = h * w
    pad = k1 // 2
    c4 = 4 * c
    kk = k1 * k1
    w1, b1, w2, b2, w3, b3 = params

    if tile_b is None:
        tile_b = _pick_tile_b(B, c, hw, kk, vmem_budget_bytes, min_grid_steps)
    assert B % tile_b == 0, "tile_b must divide b_len * n"
    tbc, tbc4 = tile_b * c, tile_b * c4
    assert tbc % 8 == 0 or tile_b == B, "tile_b*C must be a multiple of 8"
    grid = B // tile_b

    # NCHW is already contiguous as (B*C, H*W): free reshape, dense sublanes.
    x2 = x.reshape(B * c, hw)

    # ---- tiny one-off constant preprocessing --------------------------------
    taps = []
    for kh in range(k1):
        for kw in range(k1):
            taps.append((kh - pad, kw - pad, (kh - pad) * w + (kw - pad)))

    # pixel row/col index planes for in-kernel boundary masks
    hh = jnp.broadcast_to(jnp.arange(h, dtype=jnp.int32)[:, None], (h, w)).reshape(hw)
    ww = jnp.broadcast_to(jnp.arange(w, dtype=jnp.int32)[None, :], (h, w)).reshape(hw)
    pix = jnp.stack([hh, ww], axis=0)                               # (2, HW) int32

    # per-row (= per-channel, repeated over the batch tile) constants
    dwt = jnp.tile(w1.reshape(kk, c), (1, tile_b))[:, :, None]      # (KK, TBC, 1)
    b1col = jnp.tile(b1.reshape(c, 1), (tile_b, 1))                 # (TBC, 1)
    b2col = jnp.tile(b2.reshape(c4, 1), (tile_b, 1))                # (TBC4, 1)
    b3col = jnp.tile(b3.reshape(c, 1), (tile_b, 1))                 # (TBC, 1)

    eye = jnp.eye(tile_b, dtype=jnp.float32)
    w2big = jnp.kron(eye, jnp.transpose(w2))                        # (TBC4, TBC)
    w3big = jnp.kron(eye, jnp.transpose(w3))                        # (TBC, TBC4)
    gA = jnp.kron(eye, jnp.ones((c, c), jnp.float32))               # (TBC, TBC)

    kernel = functools.partial(_convnext_kernel, taps=tuple(taps),
                               img_h=h, img_w=w, c_per_sample=c)

    out = pl.pallas_call(
        kernel,
        out_shape=jax.ShapeDtypeStruct((B * c, hw), jnp.float32),
        grid_spec=pltpu.PrefetchScalarGridSpec(
            num_scalar_prefetch=0,
            grid=(grid,),
            in_specs=[
                pl.BlockSpec((tbc, hw), lambda i: (i, 0)),      # x tile (aliased out)
                pl.BlockSpec((2, hw), lambda i: (0, 0)),        # pixel index planes
                pl.BlockSpec((kk, tbc, 1), lambda i: (0, 0, 0)),  # depthwise taps
                pl.BlockSpec((tbc, 1), lambda i: (0, 0)),       # depthwise bias
                pl.BlockSpec((tbc, tbc), lambda i: (0, 0)),     # LN group-sum matrix
                pl.BlockSpec((tbc4, tbc), lambda i: (0, 0)),    # I (x) W2^T
                pl.BlockSpec((tbc4, 1), lambda i: (0, 0)),      # expand bias
                pl.BlockSpec((tbc, tbc4), lambda i: (0, 0)),    # I (x) W3^T
                pl.BlockSpec((tbc, 1), lambda i: (0, 0)),       # project bias
            ],
            out_specs=pl.BlockSpec((tbc, hw), lambda i: (i, 0)),
        ),
        input_output_aliases={0: 0},
        compiler_params=pltpu.CompilerParams(
            dimension_semantics=("parallel",),
            vmem_limit_bytes=vmem_limit_bytes),
    )(x2, pix, dwt, b1col, gA, w2big, b2col, w3big, b3col)

    return out.reshape(b_len, n, c, h, w)


def _reference(x, params, k1):
    """Pure-JAX reference mirroring the PyTorch forward (for validation)."""
    b_len, n, c, h, w = x.shape
    B = b_len * n
    w1, b1, w2, b2, w3, b3 = params
    xr = x.reshape(B, c, h, w)
    pad = k1 // 2
    wdw = jnp.transpose(w1, (2, 0, 1))[:, None, :, :]          # (C,1,k,k) OIHW
    g = jax.lax.conv_general_dilated(
        xr, wdw, (1, 1), [(pad, pad), (pad, pad)],
        dimension_numbers=("NCHW", "OIHW", "NCHW"), feature_group_count=c)
    g = g + b1.reshape(1, c, 1, 1)
    mu = jnp.mean(g, axis=(1, 2, 3), keepdims=True)
    var = jnp.mean((g - mu) ** 2, axis=(1, 2, 3), keepdims=True)
    g = (g - mu) / jnp.sqrt(var + _LN_EPS)
    h1 = jnp.einsum("bchw,cd->bdhw", g, w2) + b2.reshape(1, -1, 1, 1)
    h1 = 0.5 * h1 * (1.0 + jax.lax.erf(h1 * _INV_SQRT2))
    h2 = jnp.einsum("bdhw,dc->bchw", h1, w3) + b3.reshape(1, -1, 1, 1)
    y = h2 + xr
    return y.reshape(b_len, n, c, h, w)


if __name__ == "__main__":
    # H*W = 256 -> lane-dense blocks; B = 16 -> auto tile_b = 8, grid = 2.
    b_len, n, c, h, w, k1 = 2, 8, 4, 16, 16, 3
    key = jax.random.PRNGKey(0)
    keys = jax.random.split(key, 7)

    x = jax.random.normal(keys[0], (b_len, n, c, h, w), jnp.float32)
    # deterministic synthetic parameters (shapes from the module __init__)
    w1 = 0.1 * jax.random.normal(keys[1], (k1, k1, c), jnp.float32)    # depthwise
    b1 = 0.1 * jax.random.normal(keys[2], (1, c), jnp.float32)
    w2 = 0.1 * jax.random.normal(keys[3], (c, 4 * c), jnp.float32)     # 1x1 expand
    b2 = 0.1 * jax.random.normal(keys[4], (1, 4 * c), jnp.float32)
    w3 = 0.1 * jax.random.normal(keys[5], (4 * c, c), jnp.float32)     # 1x1 project
    b3 = 0.1 * jax.random.normal(keys[6], (1, c), jnp.float32)
    params = (w1, b1, w2, b2, w3, b3)

    y = sequence_res_convnext_block(x, params, k1)
    y = jax.block_until_ready(y)

    y_ref = _reference(x, params, k1)
    assert y.shape == (b_len, n, c, h, w)
    max_err = float(jnp.max(jnp.abs(y - y_ref)))
    assert jnp.allclose(y, y_ref, atol=5e-4, rtol=5e-4), f"max |err| = {max_err}"
    print("KERNEL_OK")
</pallas_src>

<mosaic_0001>
module attributes {stable_mosaic.version = 11 : i64} {
  func.func @_convnext_kernel(%arg0: i32, %arg1: memref<32x256xf32, #tpu.memory_space<vmem>>, %arg2: memref<2x256xi32, #tpu.memory_space<vmem>>, %arg3: memref<9x32x1xf32, #tpu.memory_space<vmem>>, %arg4: memref<32x1xf32, #tpu.memory_space<vmem>>, %arg5: memref<32x32xf32, #tpu.memory_space<vmem>>, %arg6: memref<128x32xf32, #tpu.memory_space<vmem>>, %arg7: memref<128x1xf32, #tpu.memory_space<vmem>>, %arg8: memref<32x128xf32, #tpu.memory_space<vmem>>, %arg9: memref<32x1xf32, #tpu.memory_space<vmem>>, %arg10: memref<32x256xf32, #tpu.memory_space<vmem>>) attributes {dimension_semantics = [#tpu.dimension_semantics<parallel>], iteration_bounds = array<i64: 2>, scalar_prefetch = 0 : i64, scratch_operands = 0 : i64, tpu.core_type = #tpu.core_type<tc>, window_params = [{transform_indices = @transform_0, window_bounds = array<i64: 32, 256>}, {pipeline_mode = #tpu.pipeline_mode<synchronous>, transform_indices = @transform_1, window_bounds = array<i64: 2, 256>}, {pipeline_mode = #tpu.pipeline_mode<synchronous>, transform_indices = @transform_2, window_bounds = array<i64: 9, 32, 1>}, {pipeline_mode = #tpu.pipeline_mode<synchronous>, transform_indices = @transform_3, window_bounds = array<i64: 32, 1>}, {pipeline_mode = #tpu.pipeline_mode<synchronous>, transform_indices = @transform_4, window_bounds = array<i64: 32, 32>}, {pipeline_mode = #tpu.pipeline_mode<synchronous>, transform_indices = @transform_5, window_bounds = array<i64: 128, 32>}, {pipeline_mode = #tpu.pipeline_mode<synchronous>, transform_indices = @transform_6, window_bounds = array<i64: 128, 1>}, {pipeline_mode = #tpu.pipeline_mode<synchronous>, transform_indices = @transform_7, window_bounds = array<i64: 32, 128>}, {pipeline_mode = #tpu.pipeline_mode<synchronous>, transform_indices = @transform_8, window_bounds = array<i64: 32, 1>}, {transform_indices = @transform_9, window_bounds = array<i64: 32, 256>}]} {
    %c0 = arith.constant 0 : index
    %c0_0 = arith.constant 0 : index
    %0 = vector.load %arg1[%c0, %c0_0] : memref<32x256xf32, #tpu.memory_space<vmem>>, vector<32x256xf32>
    %c0_1 = arith.constant 0 : index
    %c0_2 = arith.constant 0 : index
    %1 = vector.load %arg2[%c0_1, %c0_2] : memref<2x256xi32, #tpu.memory_space<vmem>>, vector<1x256xi32>
    %c1 = arith.constant 1 : index
    %c0_3 = arith.constant 0 : index
    %2 = vector.load %arg2[%c1, %c0_3] : memref<2x256xi32, #tpu.memory_space<vmem>>, vector<1x256xi32>
    %c1_i32 = arith.constant 1 : i32
    %3 = vector.broadcast %c1_i32 : i32 to vector<1x256xi32>
    %4 = arith.cmpi sge, %1, %3 : vector<1x256xi32>
    %5 = arith.extui %4 : vector<1x256xi1> to vector<1x256xi32>
    %6 = arith.sitofp %5 : vector<1x256xi32> to vector<1x256xf32>
    %c15_i32 = arith.constant 15 : i32
    %7 = vector.broadcast %c15_i32 : i32 to vector<1x256xi32>
    %8 = arith.cmpi slt, %1, %7 : vector<1x256xi32>
    %9 = arith.extui %8 : vector<1x256xi1> to vector<1x256xi32>
    %10 = arith.sitofp %9 : vector<1x256xi32> to vector<1x256xf32>
    %c1_i32_4 = arith.constant 1 : i32
    %11 = vector.broadcast %c1_i32_4 : i32 to vector<1x256xi32>
    %12 = arith.cmpi sge, %2, %11 : vector<1x256xi32>
    %13 = arith.extui %12 : vector<1x256xi1> to vector<1x256xi32>
    %14 = arith.sitofp %13 : vector<1x256xi32> to vector<1x256xf32>
    %c15_i32_5 = arith.constant 15 : i32
    %15 = vector.broadcast %c15_i32_5 : i32 to vector<1x256xi32>
    %16 = arith.cmpi slt, %2, %15 : vector<1x256xi32>
    %17 = arith.extui %16 : vector<1x256xi1> to vector<1x256xi32>
    %18 = arith.sitofp %17 : vector<1x256xi32> to vector<1x256xf32>
    %19 = arith.mulf %6, %14 : vector<1x256xf32>
    %20 = arith.mulf %6, %18 : vector<1x256xf32>
    %21 = arith.mulf %10, %14 : vector<1x256xf32>
    %22 = arith.mulf %10, %18 : vector<1x256xf32>
    %c0_6 = arith.constant 0 : index
    %c0_7 = arith.constant 0 : index
    %c0_8 = arith.constant 0 : index
    %23 = vector.load %arg3[%c0_6, %c0_7, %c0_8] : memref<9x32x1xf32, #tpu.memory_space<vmem>>, vector<1x32x1xf32>
    %24 = vector.shape_cast %23 : vector<1x32x1xf32> to vector<32x1xf32>
    %c17_i32 = arith.constant 17 : i32
    %25 = tpu.dynamic_rotate %0 by %c17_i32 dim 1 : vector<32x256xf32>, i32 -> vector<32x256xf32>
    %26 = vector.broadcast %24 : vector<32x1xf32> to vector<32x256xf32>
    %27 = arith.mulf %25, %26 : vector<32x256xf32>
    %28 = vector.broadcast %19 : vector<1x256xf32> to vector<32x256xf32>
    %29 = arith.mulf %27, %28 : vector<32x256xf32>
    %c1_9 = arith.constant 1 : index
    %c0_10 = arith.constant 0 : index
    %c0_11 = arith.constant 0 : index
    %30 = vector.load %arg3[%c1_9, %c0_10, %c0_11] : memref<9x32x1xf32, #tpu.memory_space<vmem>>, vector<1x32x1xf32>
    %31 = vector.shape_cast %30 : vector<1x32x1xf32> to vector<32x1xf32>
    %c16_i32 = arith.constant 16 : i32
    %32 = tpu.dynamic_rotate %0 by %c16_i32 dim 1 : vector<32x256xf32>, i32 -> vector<32x256xf32>
    %33 = vector.broadcast %31 : vector<32x1xf32> to vector<32x256xf32>
    %34 = arith.mulf %32, %33 : vector<32x256xf32>
    %35 = vector.broadcast %6 : vector<1x256xf32> to vector<32x256xf32>
    %36 = arith.mulf %34, %35 : vector<32x256xf32>
    %c2 = arith.constant 2 : index
    %c0_12 = arith.constant 0 : index
    %c0_13 = arith.constant 0 : index
    %37 = vector.load %arg3[%c2, %c0_12, %c0_13] : memref<9x32x1xf32, #tpu.memory_space<vmem>>, vector<1x32x1xf32>
    %38 = vector.shape_cast %37 : vector<1x32x1xf32> to vector<32x1xf32>
    %c15_i32_14 = arith.constant 15 : i32
    %39 = tpu.dynamic_rotate %0 by %c15_i32_14 dim 1 : vector<32x256xf32>, i32 -> vector<32x256xf32>
    %40 = vector.broadcast %38 : vector<32x1xf32> to vector<32x256xf32>
    %41 = arith.mulf %39, %40 : vector<32x256xf32>
    %42 = vector.broadcast %20 : vector<1x256xf32> to vector<32x256xf32>
    %43 = arith.mulf %41, %42 : vector<32x256xf32>
    %c3 = arith.constant 3 : index
    %c0_15 = arith.constant 0 : index
    %c0_16 = arith.constant 0 : index
    %44 = vector.load %arg3[%c3, %c0_15, %c0_16] : memref<9x32x1xf32, #tpu.memory_space<vmem>>, vector<1x32x1xf32>
    %45 = vector.shape_cast %44 : vector<1x32x1xf32> to vector<32x1xf32>
    %c1_i32_17 = arith.constant 1 : i32
    %46 = tpu.dynamic_rotate %0 by %c1_i32_17 dim 1 : vector<32x256xf32>, i32 -> vector<32x256xf32>
    %47 = vector.broadcast %45 : vector<32x1xf32> to vector<32x256xf32>
    %48 = arith.mulf %46, %47 : vector<32x256xf32>
    %49 = vector.broadcast %14 : vector<1x256xf32> to vector<32x256xf32>
    %50 = arith.mulf %48, %49 : vector<32x256xf32>
    %51 = arith.addf %29, %50 : vector<32x256xf32>
    %c4 = arith.constant 4 : index
    %c0_18 = arith.constant 0 : index
    %c0_19 = arith.constant 0 : index
    %52 = vector.load %arg3[%c4, %c0_18, %c0_19] : memref<9x32x1xf32, #tpu.memory_space<vmem>>, vector<1x32x1xf32>
    %53 = vector.shape_cast %52 : vector<1x32x1xf32> to vector<32x1xf32>
    %54 = vector.broadcast %53 : vector<32x1xf32> to vector<32x256xf32>
    %55 = arith.mulf %0, %54 : vector<32x256xf32>
    %56 = arith.addf %36, %55 : vector<32x256xf32>
    %c5 = arith.constant 5 : index
    %c0_20 = arith.constant 0 : index
    %c0_21 = arith.constant 0 : index
    %57 = vector.load %arg3[%c5, %c0_20, %c0_21] : memref<9x32x1xf32, #tpu.memory_space<vmem>>, vector<1x32x1xf32>
    %58 = vector.shape_cast %57 : vector<1x32x1xf32> to vector<32x1xf32>
    %c255_i32 = arith.constant 255 : i32
    %59 = tpu.dynamic_rotate %0 by %c255_i32 dim 1 : vector<32x256xf32>, i32 -> vector<32x256xf32>
    %60 = vector.broadcast %58 : vector<32x1xf32> to vector<32x256xf32>
    %61 = arith.mulf %59, %60 : vector<32x256xf32>
    %62 = vector.broadcast %18 : vector<1x256xf32> to vector<32x256xf32>
    %63 = arith.mulf %61, %62 : vector<32x256xf32>
    %64 = arith.addf %43, %63 : vector<32x256xf32>
    %c6 = arith.constant 6 : index
    %c0_22 = arith.constant 0 : index
    %c0_23 = arith.constant 0 : index
    %65 = vector.load %arg3[%c6, %c0_22, %c0_23] : memref<9x32x1xf32, #tpu.memory_space<vmem>>, vector<1x32x1xf32>
    %66 = vector.shape_cast %65 : vector<1x32x1xf32> to vector<32x1xf32>
    %c241_i32 = arith.constant 241 : i32
    %67 = tpu.dynamic_rotate %0 by %c241_i32 dim 1 : vector<32x256xf32>, i32 -> vector<32x256xf32>
    %68 = vector.broadcast %66 : vector<32x1xf32> to vector<32x256xf32>
    %69 = arith.mulf %67, %68 : vector<32x256xf32>
    %70 = vector.broadcast %21 : vector<1x256xf32> to vector<32x256xf32>
    %71 = arith.mulf %69, %70 : vector<32x256xf32>
    %72 = arith.addf %51, %71 : vector<32x256xf32>
    %c7 = arith.constant 7 : index
    %c0_24 = arith.constant 0 : index
    %c0_25 = arith.constant 0 : index
    %73 = vector.load %arg3[%c7, %c0_24, %c0_25] : memref<9x32x1xf32, #tpu.memory_space<vmem>>, vector<1x32x1xf32>
    %74 = vector.shape_cast %73 : vector<1x32x1xf32> to vector<32x1xf32>
    %c240_i32 = arith.constant 240 : i32
    %75 = tpu.dynamic_rotate %0 by %c240_i32 dim 1 : vector<32x256xf32>, i32 -> vector<32x256xf32>
    %76 = vector.broadcast %74 : vector<32x1xf32> to vector<32x256xf32>
    %77 = arith.mulf %75, %76 : vector<32x256xf32>
    %78 = vector.broadcast %10 : vector<1x256xf32> to vector<32x256xf32>
    %79 = arith.mulf %77, %78 : vector<32x256xf32>
    %80 = arith.addf %56, %79 : vector<32x256xf32>
    %c8 = arith.constant 8 : index
    %c0_26 = arith.constant 0 : index
    %c0_27 = arith.constant 0 : index
    %81 = vector.load %arg3[%c8, %c0_26, %c0_27] : memref<9x32x1xf32, #tpu.memory_space<vmem>>, vector<1x32x1xf32>
    %82 = vector.shape_cast %81 : vector<1x32x1xf32> to vector<32x1xf32>
    %c239_i32 = arith.constant 239 : i32
    %83 = tpu.dynamic_rotate %0 by %c239_i32 dim 1 : vector<32x256xf32>, i32 -> vector<32x256xf32>
    %84 = vector.broadcast %82 : vector<32x1xf32> to vector<32x256xf32>
    %85 = arith.mulf %83, %84 : vector<32x256xf32>
    %86 = vector.broadcast %22 : vector<1x256xf32> to vector<32x256xf32>
    %87 = arith.mulf %85, %86 : vector<32x256xf32>
    %88 = arith.addf %64, %87 : vector<32x256xf32>
    %89 = arith.addf %72, %80 : vector<32x256xf32>
    %90 = arith.addf %89, %88 : vector<32x256xf32>
    %c0_28 = arith.constant 0 : index
    %c0_29 = arith.constant 0 : index
    %91 = vector.load %arg4[%c0_28, %c0_29] : memref<32x1xf32, #tpu.memory_space<vmem>>, vector<32x1xf32>
    %92 = vector.broadcast %91 : vector<32x1xf32> to vector<32x256xf32>
    %93 = arith.addf %90, %92 : vector<32x256xf32>
    %c0_30 = arith.constant 0 : index
    %c0_31 = arith.constant 0 : index
    %94 = vector.load %arg5[%c0_30, %c0_31] : memref<32x32xf32, #tpu.memory_space<vmem>>, vector<32x32xf32>
    %cst = arith.constant dense<0.000000e+00> : vector<32x256xf32>
    %95 = tpu.matmul %94, %93, %cst {dimension_numbers = #tpu.dot_dimension_numbers<[1], [0], [0], [1], [0, 0, 1, 1], [], []>} : vector<32x32xf32>, vector<32x256xf32>, vector<32x256xf32> -> vector<32x256xf32>
    %cst_32 = arith.constant dense<0.000000e+00> : vector<32xf32>
    %96 = vector.multi_reduction <add>, %95, %cst_32 [1] : vector<32x256xf32> to vector<32xf32>
    %97 = vector.shape_cast %96 : vector<32xf32> to vector<32x1xf32>
    %cst_33 = arith.constant 9.765625E-4 : f32
    %98 = vector.broadcast %cst_33 : f32 to vector<32x1xf32>
    %99 = arith.mulf %97, %98 : vector<32x1xf32>
    %100 = vector.broadcast %99 : vector<32x1xf32> to vector<32x256xf32>
    %101 = arith.subf %93, %100 : vector<32x256xf32>
    %102 = arith.mulf %101, %101 : vector<32x256xf32>
    %cst_34 = arith.constant dense<0.000000e+00> : vector<32x256xf32>
    %103 = tpu.matmul %94, %102, %cst_34 {dimension_numbers = #tpu.dot_dimension_numbers<[1], [0], [0], [1], [0, 0, 1, 1], [], []>} : vector<32x32xf32>, vector<32x256xf32>, vector<32x256xf32> -> vector<32x256xf32>
    %cst_35 = arith.constant dense<0.000000e+00> : vector<32xf32>
    %104 = vector.multi_reduction <add>, %103, %cst_35 [1] : vector<32x256xf32> to vector<32xf32>
    %105 = vector.shape_cast %104 : vector<32xf32> to vector<32x1xf32>
    %cst_36 = arith.constant 9.765625E-4 : f32
    %106 = vector.broadcast %cst_36 : f32 to vector<32x1xf32>
    %107 = arith.mulf %105, %106 : vector<32x1xf32>
    %cst_37 = arith.constant 9.99999974E-6 : f32
    %108 = vector.broadcast %cst_37 : f32 to vector<32x1xf32>
    %109 = arith.addf %107, %108 : vector<32x1xf32>
    %110 = math.rsqrt %109 : vector<32x1xf32>
    %111 = vector.broadcast %110 : vector<32x1xf32> to vector<32x256xf32>
    %112 = arith.mulf %101, %111 : vector<32x256xf32>
    %c0_38 = arith.constant 0 : index
    %c0_39 = arith.constant 0 : index
    %113 = vector.load %arg6[%c0_38, %c0_39] : memref<128x32xf32, #tpu.memory_space<vmem>>, vector<128x32xf32>
    %cst_40 = arith.constant dense<0.000000e+00> : vector<128x256xf32>
    %114 = tpu.matmul %113, %112, %cst_40 {dimension_numbers = #tpu.dot_dimension_numbers<[1], [0], [0], [1], [0, 0, 1, 1], [], []>} : vector<128x32xf32>, vector<32x256xf32>, vector<128x256xf32> -> vector<128x256xf32>
    %c0_41 = arith.constant 0 : index
    %c0_42 = arith.constant 0 : index
    %115 = vector.load %arg7[%c0_41, %c0_42] : memref<128x1xf32, #tpu.memory_space<vmem>>, vector<128x1xf32>
    %116 = vector.broadcast %115 : vector<128x1xf32> to vector<128x256xf32>
    %117 = arith.addf %114, %116 : vector<128x256xf32>
    %cst_43 = arith.constant 5.000000e-01 : f32
    %118 = vector.broadcast %cst_43 : f32 to vector<128x256xf32>
    %119 = arith.mulf %118, %117 : vector<128x256xf32>
    %cst_44 = arith.constant 0.707106769 : f32
    %120 = vector.broadcast %cst_44 : f32 to vector<128x256xf32>
    %121 = arith.mulf %117, %120 : vector<128x256xf32>
    %122 = math.erf %121 : vector<128x256xf32>
    %cst_45 = arith.constant 1.000000e+00 : f32
    %123 = vector.broadcast %cst_45 : f32 to vector<128x256xf32>
    %124 = arith.addf %123, %122 : vector<128x256xf32>
    %125 = arith.mulf %119, %124 : vector<128x256xf32>
    %c0_46 = arith.constant 0 : index
    %c0_47 = arith.constant 0 : index
    %126 = vector.load %arg8[%c0_46, %c0_47] : memref<32x128xf32, #tpu.memory_space<vmem>>, vector<32x128xf32>
    %cst_48 = arith.constant dense<0.000000e+00> : vector<32x256xf32>
    %127 = tpu.matmul %126, %125, %cst_48 {dimension_numbers = #tpu.dot_dimension_numbers<[1], [0], [0], [1], [0, 0, 1, 1], [], []>} : vector<32x128xf32>, vector<128x256xf32>, vector<32x256xf32> -> vector<32x256xf32>
    %c0_49 = arith.constant 0 : index
    %c0_50 = arith.constant 0 : index
    %128 = vector.load %arg9[%c0_49, %c0_50] : memref<32x1xf32, #tpu.memory_space<vmem>>, vector<32x1xf32>
    %129 = vector.broadcast %128 : vector<32x1xf32> to vector<32x256xf32>
    %130 = arith.addf %127, %129 : vector<32x256xf32>
    %131 = arith.addf %130, %0 : vector<32x256xf32>
    %c0_51 = arith.constant 0 : index
    %c0_52 = arith.constant 0 : index
    %132 = vector.load %arg10[%c0_51, %c0_52] : memref<32x256xf32, #tpu.memory_space<vmem>>, vector<32x256xf32>
    tpu.vector_store %arg10[%c0_51, %c0_52], %131 {strides = array<i32>} : memref<32x256xf32, #tpu.memory_space<vmem>>, vector<32x256xf32>,
    return
  }
  func.func @transform_0(%arg0: i32) -> (i32, i32) {
    %c0_i32 = arith.constant 0 : i32
    %c0_i32_0 = arith.constant 0 : i32
    return %arg0, %c0_i32 : i32, i32
  }
  func.func @transform_1(%arg0: i32) -> (i32, i32) {
    %c0_i32 = arith.constant 0 : i32
    %c0_i32_0 = arith.constant 0 : i32
    %c0_i32_1 = arith.constant 0 : i32
    return %c0_i32, %c0_i32_0 : i32, i32
  }
  func.func @transform_2(%arg0: i32) -> (i32, i32, i32) {
    %c0_i32 = arith.constant 0 : i32
    %c0_i32_0 = arith.constant 0 : i32
    %c0_i32_1 = arith.constant 0 : i32
    %c0_i32_2 = arith.constant 0 : i32
    return %c0_i32, %c0_i32_0, %c0_i32_1 : i32, i32, i32
  }
  func.func @transform_3(%arg0: i32) -> (i32, i32) {
    %c0_i32 = arith.constant 0 : i32
    %c0_i32_0 = arith.constant 0 : i32
    %c0_i32_1 = arith.constant 0 : i32
    return %c0_i32, %c0_i32_0 : i32, i32
  }
  func.func @transform_4(%arg0: i32) -> (i32, i32) {
    %c0_i32 = arith.constant 0 : i32
    %c0_i32_0 = arith.constant 0 : i32
    %c0_i32_1 = arith.constant 0 : i32
    return %c0_i32, %c0_i32_0 : i32, i32
  }
  func.func @transform_5(%arg0: i32) -> (i32, i32) {
    %c0_i32 = arith.constant 0 : i32
    %c0_i32_0 = arith.constant 0 : i32
    %c0_i32_1 = arith.constant 0 : i32
    return %c0_i32, %c0_i32_0 : i32, i32
  }
  func.func @transform_6(%arg0: i32) -> (i32, i32) {
    %c0_i32 = arith.constant 0 : i32
    %c0_i32_0 = arith.constant 0 : i32
    %c0_i32_1 = arith.constant 0 : i32
    return %c0_i32, %c0_i32_0 : i32, i32
  }
  func.func @transform_7(%arg0: i32) -> (i32, i32) {
    %c0_i32 = arith.constant 0 : i32
    %c0_i32_0 = arith.constant 0 : i32
    %c0_i32_1 = arith.constant 0 : i32
    return %c0_i32, %c0_i32_0 : i32, i32
  }
  func.func @transform_8(%arg0: i32) -> (i32, i32) {
    %c0_i32 = arith.constant 0 : i32
    %c0_i32_0 = arith.constant 0 : i32
    %c0_i32_1 = arith.constant 0 : i32
    return %c0_i32, %c0_i32_0 : i32, i32
  }
  func.func @transform_9(%arg0: i32) -> (i32, i32) {
    %c0_i32 = arith.constant 0 : i32
    %c0_i32_0 = arith.constant 0 : i32
    return %arg0, %c0_i32 : i32, i32
  }
}

</mosaic_0001>

<bundles_post_ra>
// kernel: tpu_custom_call.1
= control target key start
LH: loop header
LB: loop body
LE: loop exit
PB: predicated region body
PF: predicated region fallthrough
CT: control target
= control target key end

     0   :  { %s3835_s0 = inlined_call_operand.hbm [shape: f32[64,256], index: 0, kind: input, shape index: {}, may-alias: {0,9}]   ;;  %s3836_s1 = inlined_call_operand.vmem [shape: s32[2,256], index: 1, kind: input, shape index: {}]   ;;  %s3837_s2 = inlined_call_operand.vmem [shape: f32[9,32,1], index: 2, kind: input, shape index: {}]   ;;  %s3838_s3 = inlined_call_operand.vmem [shape: f32[32,1], index: 3, kind: input, shape index: {}]   ;;  %s3839_s4 = inlined_call_operand.vmem [shape: f32[32,32], index: 4, kind: input, shape index: {}]   ;;  %s3840_s5 = inlined_call_operand.vmem [shape: f32[128,32], index: 5, kind: input, shape index: {}]   ;;  %s3841_s6 = inlined_call_operand.vmem [shape: f32[128,1], index: 6, kind: input, shape index: {}]   ;;  %s3842_s7 = inlined_call_operand.vmem [shape: f32[32,128], index: 7, kind: input, shape index: {}]   ;;  %s3843_s8 = inlined_call_operand.vmem [shape: f32[32,1], index: 8, kind: input, shape index: {}]   ;;  %s3844_s9 = inlined_call_operand.hbm [shape: f32[64,256], index: 9, kind: output, shape index: {}, may-alias: {0,9}]  }
   0x1   :  { %3875 = sst [smem:[#allocation28_spill]] %s3835_s0 }
   0x2   :  { %14 = vsyncpa [#allocation3], 0 }
   0x3   :  { %16 = vsyncpa [#allocation3 + $0x1], 0 }
   0x4   :  { %17 = vsyncpa [#allocation4], 0 }
   0x5   :  { %19 = vsyncpa [#allocation4 + $0x1], 0  ;;  %s2529_s30 = smov 0   ;;  %s2531_s10 = smov 0  }
   0x6   :  { %s2533_s11 = smov 0   ;;  %s2535_s12 = smov 0  }
   0x7 LB: > { %s2550_s13 = sadd.s32 4294967295, %s2462_s12   ;;  %s2088_s14 = sadd.s32 4294967294, %s2462_s12   ;;  %s2462_s12 = sphi %s2535_s12, %s3933_s12   ;;  %s2458_s11 = sphi %s2533_s11, %s3932_s11   ;;  %s2454_s10 = sphi %s2531_s10, %s3931_s10   ;;  %s2450_s30 = sphi %s2529_s30, %s3930_s30  }
   0x8   : > { %s2554_s15 = sadd.s32 1, %s2462_s12   ;;  %s32_s16 = sadd.s32 1, %s2458_s11 }
   0x9   : > { %s29_s17 = ssub.s32 %s2462_s12, %s2554_s15  ;;  %p39_p0 = scmp.ne.s32.totalorder %s2458_s11, %s2454_s10 }
   0xa   : > { %p30_p1 = scmp.eq.s32.totalorder %s29_s17, 0  ;;  %p40_p2 = scmp.eq.s32.totalorder %s2462_s12, 0 }
   0xb   : > { %p45_p3 = scmp.ne.s32.totalorder %s2454_s10, %s2450_s30  ;;  %p46_p4 = scmp.eq.s32.totalorder %s2550_s13, 0 }
   0xc   : > { %s2566_s18 = scalar_select %p30_p1, %s2458_s11, %s32_s16  }
   0xd   : > { %p2568_p5 = por %p40_p2, %p39_p0  ;;  %p2572_p6 = por %p46_p4, %p45_p3 }
   0xe   : > { %p237_p7 = scmp.eq.s32.totalorder %s2550_s13, 1  ;;  %p243_p8 = scmp.eq.s32.totalorder %s2088_s14, 1 }
   0xf   : > { %p2237_p10 = scmp.lt.s32.totalorder %s2462_s12, 2  ;;  %s287_s23 = sand.u32 1, %s2458_s11  }
  0x10   : > { %p2579_p11 = por %p237_p7, %p39_p0  ;;  %p2583_p12 = por %p243_p8, %p45_p3 }
  0x11   : > { %s2166_s24 = sshll.u32 %s2462_s12, 10  ;;  %s2091_s25 = sshll.u32 %s287_s23, 6 }
  0x12   : > { %s3878_s21 = scalar_select %p2579_p11, 1, 0 }
  0x13   : > { %s3879_s22 = scalar_select %p2583_p12, 1, 0 }
  0x14   : > { %s3880_s0 = sld [smem:[#allocation28_spill]]  ;;  %s291_s29 = scalar_lea.vmem [#allocation2], %s2091_s25 }
  0x15   : > { %s299_s14 = sshll.u32 %s291_s29, 4  ;;  %p2596_p13 = pnand %p2237_p10, %p2568_p5  ;;  %s2600_s14 = int_to_ptr.vmem [resolvable:$true] %s299_s14 }
  0x16   : > { %s2602_s17 = scalar_lea.sflag [#allocation3], %s287_s23 }
  0x17   : > { %p2368_p1 = pneg %p2596_p13 }
  0x1a   : > { %s2592_s28 = scalar_lea.hbm %s3880_s0, %s2166_s24  ;;  %s2371_s25 = scalar_lea.hbm %s3880_s0, 2048 }
  0x1b   : > { %s2366_s26 = scalar_lea.hbm %s2592_s28, 1024  ;;  %p2372_p4 = scmp.lt.u32.totalorder %s2592_s28, %s3880_s0 }
  0x1c   : > { %p2367_p0 = scmp.ne.s32.totalorder %s2592_s28, %s2366_s26  ;;  %p2373_p5 = scmp.lt.u32.totalorder %s2371_s25, %s2366_s26 }
  0x1d   : > { %p2375_p8 = scmp.lt.u32.totalorder %s2366_s26, %s2592_s28 }
  0x1e   : > { %p2369_p2 = pnand %p2368_p1, %p2367_p0  ;;  %p2374_p7 = por %p2373_p5, %p2372_p4 }
  0x20   : > { %p2370_p3 = pneg %p2369_p2  ;;  %p2376_p10 = por %p2375_p8, %p2374_p7 }
  0x22   : > { %p2377_p9 = pnand %p2376_p10, %p2370_p3 }
  0x24   : > { %2380 = shalt.err (!%p2377_p9)
}
  0x25   : > { %s2381_s23 = scalar_lea.vmem %s2600_s14, 1024  ;;  %s2464_s24 = smov [#allocation2]  }
  0x26   : > { %p2382_p0 = scmp.ne.s32.totalorder %s2600_s14, %s2381_s23  ;;  %s2386_s19 = sshll.u32 %s2464_s24, 4  ;;  %s2387_s19 = int_to_ptr.vmem [resolvable:$false] %s2386_s19 }
  0x27   : > { %s2388_s27 = scalar_lea.vmem %s2387_s19, 2048  ;;  %p2389_p11 = scmp.lt.s32.totalorder %s2600_s14, %s2387_s19 }
  0x28   : > { %p2384_p2 = pnand %p2382_p0, %p2368_p1  ;;  %p2390_p4 = scmp.lt.s32.totalorder %s2388_s27, %s2381_s23 }
  0x2a   : > { %p2385_p12 = pneg %p2384_p2  ;;  %p2391_p5 = por %p2390_p4, %p2389_p11 }
  0x2c   : > { %p2392_p7 = pnand %p2391_p5, %p2385_p12 }
  0x2e   : > { %2395 = shalt.err (!%p2392_p7)
}
  0x2f   : > { %s2465_s26 = smov 256   ;;  %s2466_s25 = smov 16  }
  0x30   : > { %2232 = dma.hbm_to_vmem [thread:$0]  (!%p2596_p13), %s2592_s28, 1024, %s2600_s14, %s2602_s17, %s2465_s26, %s2465_s26, %s2466_s25  }
  0x31   : > { %p2095_p9 = scmp.ge.s32.totalorder %s2462_s12, 1  ;;  %p307_p1 = scmp.lt.s32.totalorder %s2462_s12, 3 }
  0x33   : > { %p308_p3 = pnand %p2095_p9, %p307_p1 }
  0x35   : > { %311 = sbr.rel (%p308_p3) target bundleno = 1726 (0x6be), region = 56 }
  0x3c   : > { %s2633_s29 = sand.u32 1, %s2454_s10  }
  0x3d   : > { %s3846_s23 = sshll.u32 %s2633_s29, 6  ;;  %s314_s24 = scalar_lea.sflag [#allocation3], %s2633_s29 }
  0x3e   : > { %s2639_s19 = scalar_lea.vmem [#allocation2], %s3846_s23 }
  0x3f   : > { %2441 = dma.done.wait (%p2572_p6), %s314_s24, 1024  }
  0x40   : > { %2443 = vsyncadd (%p2572_p6), %s314_s24, 4294966272  ;;  %v2467_v0 = vmov 0   ;;  %v2103_v1 = vld [vmem:[%s3837_s2 + $0x20] sm:$0xff]  ;;  %v2104_v3 = vld [vmem:[%s3837_s2 + $0x28] sm:$0xff]  ;;  %s3851_s23 = smov 17   ;;  %v3857_v29 = vmov 0.0  }
  0x41   : > { %2285 = vset.pattern.permute.xlu1 %v2467_v0  ;;  %2284 = vset.pattern.permute.xlu0 %v2467_v0  ;;  %v381_v2 = vld [vmem:[%s3837_s2] sm:$0xff]  ;;  %v382_v4 = vld [vmem:[%s3837_s2 + $0x8] sm:$0xff]  ;;  %v384_v17 = vld [vmem:[%s3837_s2 + $0x18] sm:$0xff]  ;;  %s3847_s24 = smov 16   ;;  %s3849_s27 = smov 1   ;;  %vm1131_vm12 = vcmask 261120  }
  0x42   : > { %491 = vperm.xlu1 %2285, %v2103_v1   ;;  %414 = vperm.xlu0 %2284, %v381_v2   ;;  %v2112_v5 = vld [vmem:[%s3837_s2 + $0x68] sm:$0xff]  ;;  %v2111_v6 = vld [vmem:[%s3837_s2 + $0x60] sm:$0xff]  ;;  %v383_v18 = vld [vmem:[%s3837_s2 + $0x10] sm:$0xff]  ;;  %s2475_s17 = smov 112   ;;  %s3884_s14 = smov 17  }
  0x43   : > { %v2108_v7 = vld [vmem:[%s3837_s2 + $0x48] sm:$0xff]  ;;  %v2107_v8 = vld [vmem:[%s3837_s2 + $0x40] sm:$0xff]  ;;  %v2106_v19 = vld [vmem:[%s3837_s2 + $0x38] sm:$0xff]  ;;  %1208 = vmatprep.mubr.f32.mxu1 %v3857_v29  ;;  %1610 = vmatprep.mubr.f32.mxu0 %v3857_v29  ;;  %s3887_s16 = smov 16   ;;  %s3888_s26 = smov 1  }
  0x44   : > { %v2116_v9 = vld [vmem:[%s3837_s2 + $0x88] sm:$0xff]  ;;  %v2115_v10 = vld [vmem:[%s3837_s2 + $0x80] sm:$0xff]  ;;  %v2105_v20 = vld [vmem:[%s3837_s2 + $0x30] sm:$0xff]  ;;  %s2476_s25 = smov 111   ;;  %s2168_s28 = sshll.u32 %s2550_s13, 10 }
  0x45   : > { %v2120_v11 = vld [vmem:[%s3837_s2 + $0xa8] sm:$0xff]  ;;  %v2119_v12 = vld [vmem:[%s3837_s2 + $0xa0] sm:$0xff]  ;;  %v2114_v21 = vld [vmem:[%s3837_s2 + $0x78] sm:$0xff]  ;;  %p3927_p11 = scmp.ne.s32.totalorder %s3878_s21, 0  ;;  %s2477_s0 = smov [#allocation5]  }
  0x46   : > { %496 = vperm.xlu1 %2285, %v2104_v3   ;;  %419 = vperm.xlu0 %2284, %v382_v4   ;;  %v2124_v13 = vld [vmem:[%s3837_s2 + $0xc8] sm:$0xff]  ;;  %v2123_v14 = vld [vmem:[%s3837_s2 + $0xc0] sm:$0xff]  ;;  %v2113_v22 = vld [vmem:[%s3837_s2 + $0x70] sm:$0xff] }
  0x47   : > { %v2128_v15 = vld [vmem:[%s3837_s2 + $0xe8] sm:$0xff]  ;;  %v2127_v16 = vld [vmem:[%s3837_s2 + $0xe0] sm:$0xff]  ;;  %v2718_v25 = vld [vmem:[%s2639_s19 + $0x10] sm:$0xff] }
  0x48   : > { %v2132_v23 = vld [vmem:[%s3837_s2 + $0x108] sm:$0xff]  ;;  %v2131_v24 = vld [vmem:[%s3837_s2 + $0x100] sm:$0xff]  ;;  %v2728_v27 = vld [vmem:[%s2639_s19 + $0x18] sm:$0xff] }
  0x49   : > { %v2721_v26 = vld [vmem:[%s2639_s19] sm:$0xff]  ;;  %v2731_v28 = vld [vmem:[%s2639_s19 + $0x8] sm:$0xff]  ;;  %v2110_v30 = vld [vmem:[%s3837_s2 + $0x58] sm:$0xff] }
  0x4a   : > { %650 = vperm.xlu1 %2285, %v2112_v5   ;;  %645 = vperm.xlu0 %2284, %v2111_v6   ;;  %v2109_v31 = vld [vmem:[%s3837_s2 + $0x50] sm:$0xff]  ;;  %v2118_v32 = vld [vmem:[%s3837_s2 + $0x98] sm:$0xff]  ;;  %v2827_v43 = vld [vmem:[%s2639_s19 + $0x20] sm:$0xff] }
  0x4b   : > { %v2117_v33 = vld [vmem:[%s3837_s2 + $0x90] sm:$0xff]  ;;  %v2122_v34 = vld [vmem:[%s3837_s2 + $0xb8] sm:$0xff]  ;;  %3883 = vst [vmem:[#allocation9_spill] sm:$0xff] %v2827_v43  ;;  %v2841_v47 = vld [vmem:[%s2639_s19 + $0x28] sm:$0xff] }
  0x4c   : > { %v2121_v35 = vld [vmem:[%s3837_s2 + $0xb0] sm:$0xff]  ;;  %v2126_v36 = vld [vmem:[%s3837_s2 + $0xd8] sm:$0xff]  ;;  %3886 = vst [vmem:[#allocation11_spill] sm:$0xff] %v2841_v47 }
  0x4d   : > { %v2125_v37 = vld [vmem:[%s3837_s2 + $0xd0] sm:$0xff]  ;;  %v2130_v38 = vld [vmem:[%s3837_s2 + $0xf8] sm:$0xff] }
  0x4e   : > { %573 = vperm.xlu1 %2285, %v2108_v7   ;;  %568 = vperm.xlu0 %2284, %v2107_v8   ;;  %v2129_v39 = vld [vmem:[%s3837_s2 + $0xf0] sm:$0xff]  ;;  %v2134_v40 = vld [vmem:[%s3837_s2 + $0x118] sm:$0xff] }
  0x4f   : > { %v2133_v41 = vld [vmem:[%s3837_s2 + $0x110] sm:$0xff]  ;;  %v2838_v46 = vld [vmem:[%s2639_s19 + $0x38] sm:$0xff] }
  0x50   : > { %v2824_v42 = vld [vmem:[%s2639_s19 + $0x30] sm:$0xff]  ;;  %3885 = vst [vmem:[#allocation10_spill] sm:$0xff] %v2838_v46 }
  0x51   : > { %3882 = vst [vmem:[#allocation8_spill] sm:$0xff] %v2824_v42 }
  0x52   : > { %710 = vperm.xlu1 %2285, %v2116_v9   ;;  %705 = vperm.xlu0 %2284, %v2115_v10  }
  0x56   : > { %776 = vperm.xlu1 %2285, %v2120_v11   ;;  %771 = vperm.xlu0 %2284, %v2119_v12  }
  0x5a   : > { %861 = vperm.xlu1 %2285, %v2124_v13   ;;  %856 = vperm.xlu0 %2284, %v2123_v14   ;;  %v1096_v14 = vld [vmem:[%s3838_s3 + $0x8] sm:$0xff] }
  0x5e   : > { %946 = vperm.xlu1 %2285, %v2128_v15   ;;  %941 = vperm.xlu0 %2284, %v2127_v16   ;;  %v1095_v15 = vld [vmem:[%s3838_s3] sm:$0xff]  ;;  %v401_v16 = vlaneseq }
  0x62   : > { %429 = vperm.xlu1 %2285, %v384_v17   ;;  %424 = vperm.xlu0 %2284, %v383_v18  }
  0x66   : > { %506 = vperm.xlu1 %2285, %v2106_v19   ;;  %501 = vperm.xlu0 %2284, %v2105_v20   ;;  %v2973_v19 = vand.u32 127, %v401_v16 }
  0x68   : > { %vm634_vm0 = vcmp.lt.s32.totalorder %v2973_v19, 1  ;;  %vm403_vm5 = vcmp.lt.s32.totalorder %v2973_v19, 17  ;;  %vm557_vm6 = vcmp.lt.s32.totalorder %v2973_v19, 15  ;;  %vm480_vm7 = vcmp.lt.s32.totalorder %v2973_v19, 16 }
  0x69   : > { %vm760_vm8 = vcmp.lt.s32.totalorder %v2973_v19, 127  ;;  %vm845_vm9 = vcmp.lt.s32.totalorder %v2973_v19, 113  ;;  %vm930_vm10 = vcmp.lt.s32.totalorder %v2973_v19, 112  ;;  %vm1015_vm11 = vcmp.lt.s32.totalorder %v2973_v19, 111 }
  0x6a   : > { %660 = vperm.xlu1 %2285, %v2114_v21   ;;  %655 = vperm.xlu0 %2284, %v2113_v22  }
  0x6e   : > { %1031 = vperm.xlu1 %2285, %v2132_v23   ;;  %1026 = vperm.xlu0 %2284, %v2131_v24  }
  0x72   : > { %387 = vrot.lane.b32.xlu1 %v2718_v25, %s3851_s23  ;;  %385 = vrot.lane.b32.xlu0 %v2721_v26, %s3851_s23 }
  0x76   : > { %395 = vrot.lane.b32.xlu1 %v2728_v27, %s3851_s23  ;;  %393 = vrot.lane.b32.xlu0 %v2731_v28, %s3851_s23  ;;  %s2473_s23 = smov 127  }
  0x7a   : > { %466 = vrot.lane.b32.xlu1 %v2718_v25, %s3847_s24  ;;  %464 = vrot.lane.b32.xlu0 %v2721_v26, %s3847_s24 }
  0x7e   : > { %474 = vrot.lane.b32.xlu1 %v2728_v27, %s3847_s24  ;;  %472 = vrot.lane.b32.xlu0 %v2731_v28, %s3847_s24  ;;  %s2472_s24 = smov 15  }
  0x82   : > { %583 = vperm.xlu1 %2285, %v2110_v30   ;;  %578 = vperm.xlu0 %2284, %v2109_v31  }
  0x86   : > { %620 = vrot.lane.b32.xlu1 %v2718_v25, %s3849_s27  ;;  %618 = vrot.lane.b32.xlu0 %v2721_v26, %s3849_s27 }
  0x8a   : > { %628 = vrot.lane.b32.xlu1 %v2728_v27, %s3849_s27  ;;  %626 = vrot.lane.b32.xlu0 %v2731_v28, %s3849_s27  ;;  %s2474_s27 = smov 113  }
  0x8e   : > { %720 = vperm.xlu1 %2285, %v2118_v32   ;;  %715 = vperm.xlu0 %2284, %v2117_v33   ;;  %v1098_v33 = vld [vmem:[%s3838_s3 + $0x18] sm:$0xff] }
  0x92   : > { %786 = vperm.xlu1 %2285, %v2122_v34   ;;  %781 = vperm.xlu0 %2284, %v2121_v35   ;;  %v1097_v34 = vld [vmem:[%s3838_s3 + $0x10] sm:$0xff] }
  0x96   : > { %871 = vperm.xlu1 %2285, %v2126_v36   ;;  %866 = vperm.xlu0 %2284, %v2125_v37  }
  0x9a   : > { %956 = vperm.xlu1 %2285, %v2130_v38   ;;  %951 = vperm.xlu0 %2284, %v2129_v39   ;;  %v362_v39 = vld [vmem:[%s3836_s1] ss:$2 sm:$0x3] }
  0x9b   : > { %vm365_vm1 = vcmp.ge.s32.totalorder %v362_v39, 1  ;;  %vm368_vm4 = vcmp.lt.s32.totalorder %v362_v39, 15 }
  0x9e   : > { %543 = vrot.lane.b32.xlu1 %v2718_v25, %s2472_s24  ;;  %541 = vrot.lane.b32.xlu0 %v2721_v26, %s2472_s24 }
  0xa2   : > { %551 = vrot.lane.b32.xlu1 %v2728_v27, %s2472_s24  ;;  %549 = vrot.lane.b32.xlu0 %v2731_v28, %s2472_s24 }
  0xa6   : > { %746 = vrot.lane.b32.xlu1 %v2718_v25, %s2473_s23  ;;  %744 = vrot.lane.b32.xlu0 %v2721_v26, %s2473_s23 }
  0xaa   : > { %754 = vrot.lane.b32.xlu1 %v2728_v27, %s2473_s23  ;;  %752 = vrot.lane.b32.xlu0 %v2731_v28, %s2473_s23 }
  0xae   : > { %831 = vrot.lane.b32.xlu1 %v2718_v25, %s2474_s27  ;;  %829 = vrot.lane.b32.xlu0 %v2721_v26, %s2474_s27 }
  0xb2   : > { %839 = vrot.lane.b32.xlu1 %v2728_v27, %s2474_s27  ;;  %837 = vrot.lane.b32.xlu0 %v2731_v28, %s2474_s27 }
  0xb6   : > { %916 = vrot.lane.b32.xlu1 %v2718_v25, %s2475_s17  ;;  %914 = vrot.lane.b32.xlu0 %v2721_v26, %s2475_s17 }
  0xba   : > { %924 = vrot.lane.b32.xlu1 %v2728_v27, %s2475_s17  ;;  %922 = vrot.lane.b32.xlu0 %v2731_v28, %s2475_s17 }
  0xbe   : > { %1041 = vperm.xlu1 %2285, %v2134_v40   ;;  %1036 = vperm.xlu0 %2284, %v2133_v41   ;;  %v2098_v40 = vld [vmem:[%s3836_s1 + $0x1] ss:$2 sm:$0x3] }
  0xbf   : > { %vm371_vm2 = vcmp.ge.s32.totalorder %v2098_v40, 1  ;;  %vm374_vm3 = vcmp.lt.s32.totalorder %v2098_v40, 15 }
  0xc1   : > { %v2829_v44 = vpop.permute.xlu1 %491  ;;  %v2831_v45 = vpop.permute.xlu0 %414 }
  0xc2   : > { %391 = vrot.lane.b32.xlu1 %v2824_v42, %s3884_s14  ;;  %389 = vrot.lane.b32.xlu0 %v2827_v43, %s3884_s14 }
  0xc5   : > { %v2843_v48 = vpop.permute.xlu1 %496  ;;  %v2845_v49 = vpop.permute.xlu0 %419 }
  0xc6   : > { %399 = vrot.lane.b32.xlu1 %v2838_v46, %s3884_s14  ;;  %397 = vrot.lane.b32.xlu0 %v2841_v47, %s3884_s14 }
  0xc9   : > { %v2851_v50 = vpop.permute.xlu1 %650  ;;  %v2853_v51 = vpop.permute.xlu0 %645 }
  0xca   : > { %470 = vrot.lane.b32.xlu1 %v2824_v42, %s3887_s16  ;;  %468 = vrot.lane.b32.xlu0 %v2827_v43, %s3887_s16 }
  0xcd   : > { %v2859_v52 = vpop.permute.xlu1 %573  ;;  %v2861_v53 = vpop.permute.xlu0 %568 }
  0xce   : > { %478 = vrot.lane.b32.xlu1 %v2838_v46, %s3887_s16  ;;  %476 = vrot.lane.b32.xlu0 %v2841_v47, %s3887_s16 }
  0xd1   : > { %v2867_v54 = vpop.permute.xlu1 %710  ;;  %v2869_v55 = vpop.permute.xlu0 %705 }
  0xd2   : > { %624 = vrot.lane.b32.xlu1 %v2824_v42, %s3888_s26  ;;  %622 = vrot.lane.b32.xlu0 %v2827_v43, %s3888_s26 }
  0xd5   : > { %v2875_v56 = vpop.permute.xlu1 %776  ;;  %v2877_v57 = vpop.permute.xlu0 %771 }
  0xd6   : > { %632 = vrot.lane.b32.xlu1 %v2838_v46, %s3888_s26  ;;  %630 = vrot.lane.b32.xlu0 %v2841_v47, %s3888_s26 }
  0xd9   : > { %v2883_v58 = vpop.permute.xlu1 %861  ;;  %v2885_v59 = vpop.permute.xlu0 %856 }
  0xda   : > { %1001 = vrot.lane.b32.xlu1 %v2718_v25, %s2476_s25  ;;  %999 = vrot.lane.b32.xlu0 %v2721_v26, %s2476_s25 }
  0xdd   : > { %v2891_v60 = vpop.permute.xlu1 %946  ;;  %v2893_v61 = vpop.permute.xlu0 %941 }
  0xde   : > { %1009 = vrot.lane.b32.xlu1 %v2728_v27, %s2476_s25  ;;  %1007 = vrot.lane.b32.xlu0 %v2731_v28, %s2476_s25 }
  0xe1   : > { %v2899_v62 = vpop.permute.xlu1 %429  ;;  %v2901_v63 = vpop.permute.xlu0 %424 }
  0xe2   : > { %3889 = vst [vmem:[#allocation12_spill] sm:$0xff] %v2899_v62  ;;  %3890 = vst [vmem:[#allocation13_spill] sm:$0xff] %v2901_v63  ;;  %547 = vrot.lane.b32.xlu1 %v2824_v42, %s2472_s24  ;;  %545 = vrot.lane.b32.xlu0 %v2827_v43, %s2472_s24 }
  0xe5   : > { %v2907_v0 = vpop.permute.xlu1 %506  ;;  %v2909_v1 = vpop.permute.xlu0 %501 }
  0xe6   : > { %3891 = vst [vmem:[#allocation14_spill] sm:$0xff] %v2907_v0  ;;  %3892 = vst [vmem:[#allocation15_spill] sm:$0xff] %v2909_v1  ;;  %555 = vrot.lane.b32.xlu1 %v2838_v46, %s2472_s24  ;;  %553 = vrot.lane.b32.xlu0 %v2841_v47, %s2472_s24  ;;  %s3788_s24 = scalar_lea.hbm %s3844_s9, %s2168_s28 }
  0xe9   : > { %v2915_v2 = vpop.permute.xlu1 %660  ;;  %v2917_v3 = vpop.permute.xlu0 %655 }
  0xea   : > { %3893 = vst [vmem:[#allocation16_spill] sm:$0xff] %v2915_v2  ;;  %3894 = vst [vmem:[#allocation17_spill] sm:$0xff] %v2917_v3  ;;  %750 = vrot.lane.b32.xlu1 %v2824_v42, %s2473_s23  ;;  %748 = vrot.lane.b32.xlu0 %v2827_v43, %s2473_s23 }
  0xed   : > { %v2923_v4 = vpop.permute.xlu1 %1031  ;;  %v2925_v5 = vpop.permute.xlu0 %1026 }
  0xee   : > { %758 = vrot.lane.b32.xlu1 %v2838_v46, %s2473_s23  ;;  %756 = vrot.lane.b32.xlu0 %v2841_v47, %s2473_s23  ;;  %s2400_s23 = sshll.u32 %s2477_s0, 4  ;;  %s2401_s23 = int_to_ptr.vmem [resolvable:$false] %s2400_s23 }
  0xf1   : > { %v2931_v6 = vpop.permute.xlu1 %387  ;;  %v2933_v7 = vpop.permute.xlu0 %385 }
  0xf2   : > { %835 = vrot.lane.b32.xlu1 %v2824_v42, %s2474_s27  ;;  %833 = vrot.lane.b32.xlu0 %v2827_v43, %s2474_s27 }
  0xf5   : > { %v2939_v8 = vpop.permute.xlu1 %395  ;;  %v2941_v9 = vpop.permute.xlu0 %393 }
  0xf6   : > { %843 = vrot.lane.b32.xlu1 %v2838_v46, %s2474_s27  ;;  %841 = vrot.lane.b32.xlu0 %v2841_v47, %s2474_s27  ;;  %v405_v39 = vsel %vm403_vm5, %v2931_v6, %v2939_v8  ;;  %v409_v40 = vsel %vm403_vm5, %v2939_v8, %v2931_v6  ;;  %s3926_s27 = sshll.u32 %s2633_s29, 6 }
  0xf7   : > { %s3767_s20 = scalar_lea.vmem [#allocation5], %s3926_s27  ;;  %s2402_s27 = scalar_lea.vmem %s2401_s23, 2048 }
  0xf9   : > { %v2947_v10 = vpop.permute.xlu1 %466  ;;  %v2949_v11 = vpop.permute.xlu0 %464 }
  0xfa   : > { %920 = vrot.lane.b32.xlu1 %v2824_v42, %s2475_s17  ;;  %918 = vrot.lane.b32.xlu0 %v2827_v43, %s2475_s17 }
  0xfd   : > { %v2955_v12 = vpop.permute.xlu1 %474  ;;  %v2957_v13 = vpop.permute.xlu0 %472 }
  0xfe   : > { %928 = vrot.lane.b32.xlu1 %v2838_v46, %s2475_s17  ;;  %926 = vrot.lane.b32.xlu0 %v2841_v47, %s2475_s17  ;;  %s2015_s17 = sshll.u32 %s3767_s20, 4  ;;  %s3781_s17 = int_to_ptr.vmem [resolvable:$true] %s2015_s17 }
  0xff   : > { %s2396_s13 = scalar_lea.vmem %s3781_s17, 1024  ;;  %p2403_p8 = scmp.lt.s32.totalorder %s3781_s17, %s2401_s23 }
 0x100   : > { %p2397_p6 = scmp.ne.s32.totalorder %s3781_s17, %s2396_s13  ;;  %p2404_p10 = scmp.lt.s32.totalorder %s2402_s27, %s2396_s13 }
 0x101   : > { %v2969_v17 = vpop.permute.xlu1 %583  ;;  %v2971_v18 = vpop.permute.xlu0 %578 }
 0x102   : > { %3895 = vst [vmem:[#allocation18_spill] sm:$0xff] %v2969_v17  ;;  %3896 = vst [vmem:[#allocation19_spill] sm:$0xff] %v2971_v18  ;;  %1106 = vperm.xlu1 %2285, %v1096_v14   ;;  %1101 = vperm.xlu0 %2284, %v1095_v15   ;;  %v442_v15 = vshrl.u32 %v401_v16, 7  ;;  %v3036_v16 = vsel %vm374_vm3, 1.0, %v3857_v29  ;;  %p2398_p12 = pnand %p2397_p6, %p3927_p11  ;;  %p2405_p0 = por %p2404_p10, %p2403_p8 }
 0x104   : > { %v3033_v18 = vsub.s32 1, %v442_v15  ;;  %p2399_p13 = pneg %p2398_p12 }
 0x105   : > { %v621_v20 = vpop.permute.xlu1 %620  ;;  %v619_v21 = vpop.permute.xlu0 %618 }
 0x106   : > { %1005 = vrot.lane.b32.xlu1 %v2824_v42, %s2476_s25  ;;  %1003 = vrot.lane.b32.xlu0 %v2827_v43, %s2476_s25  ;;  %p2406_p2 = pnand %p2405_p0, %p2399_p13 }
 0x109   : > { %v629_v22 = vpop.permute.xlu1 %628  ;;  %v627_v23 = vpop.permute.xlu0 %626 }
 0x10a   : > { %v2982_v24 = vsel %vm634_vm0, %v621_v20, %v629_v22  ;;  %v2986_v30 = vsel %vm634_vm0, %v629_v22, %v621_v20  ;;  %v2990_v31 = vsel %vm634_vm0, %v619_v21, %v627_v23  ;;  %v2994_v32 = vsel %vm634_vm0, %v627_v23, %v619_v21  ;;  %1013 = vrot.lane.b32.xlu1 %v2838_v46, %s2476_s25 }
 0x10b   : > { %1011 = vrot.lane.b32.xlu0 %v2841_v47, %s2476_s25  ;;  %v2099_v22 = vsel %vm365_vm1, 1.0, %v3857_v29  ;;  %v2101_v23 = vsel %vm371_vm2, 1.0, %v3857_v29  ;;  %v435_v47 = vmul.f32 %v2845_v49, %v405_v39  ;;  %s2001_s25 = scalar_lea.sflag [#allocation4], %s2633_s29 }
 0x10d   : > { %v3006_v35 = vpop.permute.xlu1 %720  ;;  %v3008_v36 = vpop.permute.xlu0 %715 }
 0x10e   : > { %3897 = vst [vmem:[#allocation20_spill] sm:$0xff] %v3006_v35  ;;  %3898 = vst [vmem:[#allocation21_spill] sm:$0xff] %v3008_v36  ;;  %1116 = vperm.xlu1 %2285, %v1098_v33   ;;  %v377_v33 = vmul.f32 %v2101_v23, %v2099_v22 }
 0x10f   : > { %1111 = vperm.xlu0 %2284, %v1097_v34   ;;  %v3031_v34 = vsub.s32 0, %v442_v15  ;;  %v404_v15 = vsel %vm403_vm5, %v2933_v7, %v2941_v9 }
 0x110   : > { %v3062_v17 = vrot.slane %v377_v33, %v3033_v18  ;;  %v433_v43 = vmul.f32 %v2831_v45, %v404_v15 }
 0x111   : > { %v3010_v37 = vpop.permute.xlu1 %786  ;;  %v3012_v38 = vpop.permute.xlu0 %781  ;;  %v3080_v46 = vrot.slane %v2099_v22, %v3031_v34 }
 0x112   : > { %3899 = vst [vmem:[#allocation22_spill] sm:$0xff] %v3010_v37  ;;  %3900 = vst [vmem:[#allocation23_spill] sm:$0xff] %v3012_v38  ;;  %v452_v42 = vmul.f32 %v3062_v17, %v433_v43  ;;  %v664_v43 = vmul.f32 %v2853_v51, %v2990_v31 }
 0x115   : > { %v3020_v41 = vpop.permute.xlu1 %871  ;;  %v3022_v14 = vpop.permute.xlu0 %866 }
 0x116   : > { %3901 = vst [vmem:[#allocation24_spill] sm:$0xff] %v3020_v41  ;;  %3902 = vst [vmem:[#allocation25_spill] sm:$0xff] %v3022_v14  ;;  %v378_v14 = vmul.f32 %v3036_v16, %v2099_v22 }
 0x119   : > { %v3024_v20 = vpop.permute.xlu1 %956  ;;  %v3026_v21 = vpop.permute.xlu0 %951 }
 0x11a   : > { %3903 = vst [vmem:[#allocation26_spill] sm:$0xff] %v3024_v20  ;;  %3904 = vst [vmem:[#allocation27_spill] sm:$0xff] %v3026_v21  ;;  %v3039_v21 = vsel %vm368_vm4, 1.0, %v3857_v29  ;;  %v408_v29 = vsel %vm403_vm5, %v2941_v9, %v2933_v7  ;;  %v3059_v20 = vrot.slane %v377_v33, %v3031_v34  ;;  %v434_v33 = vmul.f32 %v2845_v49, %v409_v40 }
 0x11b   : > { %v379_v8 = vmul.f32 %v2101_v23, %v3039_v21  ;;  %v432_v36 = vmul.f32 %v2831_v45, %v408_v29  ;;  %v3092_v49 = vrot.slane %v378_v14, %v3031_v34  ;;  %v3095_v29 = vrot.slane %v378_v14, %v3033_v18 }
 0x11c   : > { %v3104_v40 = vrot.slane %v3036_v16, %v3033_v18  ;;  %v453_v14 = vmul.f32 %v3059_v20, %v434_v33 }
 0x11d   : > { %v544_v38 = vpop.permute.xlu1 %543  ;;  %v542_v37 = vpop.permute.xlu0 %541  ;;  %v3110_v15 = vrot.slane %v379_v8, %v3033_v18  ;;  %v451_v35 = vmul.f32 %v3059_v20, %v432_v36  ;;  %v663_v36 = vmul.f32 %v2853_v51, %v2994_v32 }
 0x121   : > { %v552_v41 = vpop.permute.xlu1 %551  ;;  %v550_v6 = vpop.permute.xlu0 %549 }
 0x122   : > { %v559_v3 = vsel %vm557_vm6, %v544_v38, %v552_v41  ;;  %v563_v63 = vsel %vm557_vm6, %v552_v41, %v544_v38  ;;  %v558_v7 = vsel %vm557_vm6, %v542_v37, %v550_v6  ;;  %v562_v9 = vsel %vm557_vm6, %v550_v6, %v542_v37 }
 0x123   : > { %v3083_v38 = vrot.slane %v2099_v22, %v3033_v18  ;;  %v3086_v41 = vrot.slane %v2101_v23, %v3031_v34  ;;  %v3089_v37 = vrot.slane %v2101_v23, %v3033_v18  ;;  %v3100_v22 = vrot.slane %v3036_v16, %v3031_v34 }
 0x124   : > { %v3107_v23 = vrot.slane %v379_v8, %v3031_v34  ;;  %v454_v6 = vmul.f32 %v3062_v17, %v435_v47  ;;  %v588_v2 = vmul.f32 %v2859_v52, %v563_v63  ;;  %v589_v1 = vmul.f32 %v2859_v52, %v559_v3 }
 0x125   : > { %v747_v45 = vpop.permute.xlu1 %746  ;;  %v745_v39 = vpop.permute.xlu0 %744  ;;  %v586_v0 = vmul.f32 %v2861_v53, %v562_v9  ;;  %v587_v62 = vmul.f32 %v2861_v53, %v558_v7  ;;  %v665_v8 = vmul.f32 %v2851_v50, %v2986_v30  ;;  %v666_v47 = vmul.f32 %v2851_v50, %v2982_v24 }
 0x126   : > { %v607_v32 = vmul.f32 %v3092_v49, %v588_v2  ;;  %v608_v7 = vmul.f32 %v3095_v29, %v589_v1  ;;  %v485_v1 = vsel %vm480_vm7, %v2957_v13, %v2949_v11 }
 0x127   : > { %v605_v9 = vmul.f32 %v3092_v49, %v586_v0  ;;  %v481_v0 = vsel %vm480_vm7, %v2949_v11, %v2957_v13  ;;  %v509_v13 = vmul.f32 %v2829_v44, %v485_v1 }
 0x129   : > { %v755_v33 = vpop.permute.xlu1 %754  ;;  %v753_v63 = vpop.permute.xlu0 %752 }
 0x12a   : > { %v762_v52 = vsel %vm760_vm8, %v747_v45, %v755_v33  ;;  %v766_v53 = vsel %vm760_vm8, %v755_v33, %v747_v45  ;;  %v761_v3 = vsel %vm760_vm8, %v745_v39, %v753_v63  ;;  %v765_v50 = vsel %vm760_vm8, %v753_v63, %v745_v39 }
 0x12b   : > { %v791_v24 = vmul.f32 %v2875_v56, %v762_v52  ;;  %v792_v30 = vmul.f32 %v2875_v56, %v766_v53  ;;  %v789_v51 = vmul.f32 %v2877_v57, %v761_v3  ;;  %v790_v31 = vmul.f32 %v2877_v57, %v765_v50 }
 0x12c   : > { %v606_v45 = vmul.f32 %v3095_v29, %v587_v62  ;;  %v482_v57 = vsel %vm480_vm7, %v2947_v10, %v2955_v12  ;;  %v486_v62 = vsel %vm480_vm7, %v2955_v12, %v2947_v10  ;;  %v684_v10 = vmul.f32 %v3086_v41, %v665_v8 }
 0x12d   : > { %v810_v33 = vmul.f32 %v3100_v22, %v791_v24  ;;  %v811_v39 = vmul.f32 %v3104_v40, %v792_v30  ;;  %v808_v63 = vmul.f32 %v3100_v22, %v789_v51  ;;  %v809_v56 = vmul.f32 %v3104_v40, %v790_v31  ;;  %v832_v52 = vpop.permute.xlu1 %831  ;;  %v830_v53 = vpop.permute.xlu0 %829 }
 0x12e   : > { %v685_v12 = vmul.f32 %v3089_v37, %v666_v47  ;;  %v682_v30 = vmul.f32 %v3086_v41, %v663_v36  ;;  %v683_v51 = vmul.f32 %v3089_v37, %v664_v43  ;;  %v511_v31 = vmul.f32 %v2843_v48, %v486_v62 }
 0x12f   : > { %v3165_v2 = vadd.f32 %v810_v33, %v607_v32  ;;  %v3167_v3 = vadd.f32 %v811_v39, %v608_v7  ;;  %v3169_v50 = vadd.f32 %v808_v63, %v605_v9  ;;  %v3171_v24 = vadd.f32 %v809_v56, %v606_v45 }
 0x130   : > { %v512_v11 = vmul.f32 %v2843_v48, %v482_v57  ;;  %v510_v32 = vmul.f32 %v2829_v44, %v481_v0  ;;  %v692_v39 = vadd.f32 %v684_v10, %v453_v14  ;;  %v693_v63 = vadd.f32 %v685_v12, %v454_v6 }
 0x131   : > { %v840_v7 = vpop.permute.xlu1 %839  ;;  %v838_v9 = vpop.permute.xlu0 %837  ;;  %v690_v56 = vadd.f32 %v682_v30, %v451_v35  ;;  %v691_v57 = vadd.f32 %v683_v51, %v452_v42  ;;  %v530_v10 = vmul.f32 %v3080_v46, %v511_v31  ;;  %v528_v30 = vmul.f32 %v3080_v46, %v509_v13 }
 0x132   : > { %v847_v45 = vsel %vm845_vm9, %v832_v52, %v840_v7  ;;  %v851_v8 = vsel %vm845_vm9, %v840_v7, %v832_v52  ;;  %v846_v47 = vsel %vm845_vm9, %v830_v53, %v838_v9  ;;  %v850_v36 = vsel %vm845_vm9, %v838_v9, %v830_v53 }
 0x133   : > { %v876_v48 = vmul.f32 %v2883_v58, %v847_v45  ;;  %v877_v43 = vmul.f32 %v2883_v58, %v851_v8  ;;  %v874_v44 = vmul.f32 %v2885_v59, %v846_v47  ;;  %v875_v33 = vmul.f32 %v2885_v59, %v850_v36 }
 0x134   : > { %v3200_v58 = vrot.slane %v3039_v21, %v3031_v34  ;;  %v3204_v59 = vrot.slane %v3039_v21, %v3033_v18  ;;  %v531_v12 = vmul.f32 %v3083_v38, %v512_v11  ;;  %v529_v51 = vmul.f32 %v3083_v38, %v510_v32 }
 0x135   : > { %v895_v52 = vmul.f32 %v3107_v23, %v876_v48  ;;  %v896_v62 = vmul.f32 %v3110_v15, %v877_v43  ;;  %v893_v0 = vmul.f32 %v3107_v23, %v874_v44  ;;  %v894_v53 = vmul.f32 %v3110_v15, %v875_v33  ;;  %v917_v1 = vpop.permute.xlu1 %916  ;;  %v915_v7 = vpop.permute.xlu0 %914 }
 0x136   : > { %v725_v9 = vmul.f32 %v2867_v54, %v2718_v25  ;;  %v726_v45 = vmul.f32 %v2867_v54, %v2728_v27  ;;  %v723_v8 = vmul.f32 %v2869_v55, %v2721_v26  ;;  %v724_v47 = vmul.f32 %v2869_v55, %v2731_v28 }
 0x137   : > { %v903_v42 = vadd.f32 %v895_v52, %v692_v39  ;;  %v904_v35 = vadd.f32 %v896_v62, %v693_v63  ;;  %v901_v14 = vadd.f32 %v893_v0, %v690_v56  ;;  %v902_v6 = vadd.f32 %v894_v53, %v691_v57 }
 0x138   : > { %v733_v32 = vadd.f32 %v725_v9, %v530_v10  ;;  %v734_v48 = vadd.f32 %v726_v45, %v531_v12  ;;  %v731_v43 = vadd.f32 %v723_v8, %v528_v30  ;;  %v732_v44 = vadd.f32 %v724_v47, %v529_v51 }
 0x139   : > { %v925_v36 = vpop.permute.xlu1 %924  ;;  %v923_v31 = vpop.permute.xlu0 %922 }
 0x13a   : > { %v932_v11 = vsel %vm930_vm10, %v917_v1, %v925_v36  ;;  %v936_v13 = vsel %vm930_vm10, %v925_v36, %v917_v1  ;;  %v931_v25 = vsel %vm930_vm10, %v915_v7, %v923_v31  ;;  %v935_v27 = vsel %vm930_vm10, %v923_v31, %v915_v7 }
 0x13b   : > { %v961_v54 = vmul.f32 %v2891_v60, %v932_v11  ;;  %v962_v26 = vmul.f32 %v2891_v60, %v936_v13  ;;  %v959_v28 = vmul.f32 %v2893_v61, %v931_v25  ;;  %v960_v55 = vmul.f32 %v2893_v61, %v935_v27 }
 0x13d   : > { %v980_v33 = vmul.f32 %v3200_v58, %v961_v54  ;;  %v981_v39 = vmul.f32 %v3204_v59, %v962_v26  ;;  %v978_v63 = vmul.f32 %v3200_v58, %v959_v28  ;;  %v979_v56 = vmul.f32 %v3204_v59, %v960_v55  ;;  %v3234_v57 = vpop.permute.xlu1 %1041  ;;  %v3236_v52 = vpop.permute.xlu0 %1036 }
 0x13e   : > { %v380_v26 = vmul.f32 %v3036_v16, %v3039_v21 }
 0x13f   : > { %v988_v60 = vadd.f32 %v980_v33, %v733_v32  ;;  %v989_v62 = vadd.f32 %v981_v39, %v734_v48  ;;  %v986_v0 = vadd.f32 %v978_v63, %v731_v43  ;;  %v987_v61 = vadd.f32 %v979_v56, %v732_v44 }
 0x140   : > { %v3254_v28 = vrot.slane %v380_v26, %v3031_v34  ;;  %v3257_v55 = vrot.slane %v380_v26, %v3033_v18 }
 0x141   : > { %v392_v53 = vpop.permute.xlu1 %391  ;;  %v390_v1 = vpop.permute.xlu0 %389  ;;  %v1082_v7 = vadd.f32 %v989_v62, %v904_v35  ;;  %v1081_v10 = vadd.f32 %v988_v60, %v903_v42  ;;  %v1080_v12 = vadd.f32 %v987_v61, %v902_v6  ;;  %v1079_v30 = vadd.f32 %v986_v0, %v901_v14 }
 0x145   : > { %v400_v51 = vpop.permute.xlu1 %399  ;;  %v398_v9 = vpop.permute.xlu0 %397 }
 0x146   : > { %v407_v45 = vsel %vm403_vm5, %v392_v53, %v400_v51  ;;  %v411_v8 = vsel %vm403_vm5, %v400_v51, %v392_v53  ;;  %v3244_v47 = vsel %vm403_vm5, %v390_v1, %v398_v9  ;;  %v3248_v36 = vsel %vm403_vm5, %v398_v9, %v390_v1 }
 0x149   : > { %v471_v35 = vpop.permute.xlu1 %470  ;;  %v469_v42 = vpop.permute.xlu0 %468 }
 0x14d   : > { %v479_v6 = vpop.permute.xlu1 %478  ;;  %v477_v14 = vpop.permute.xlu0 %476 }
 0x151   : > { %v625_v31 = vpop.permute.xlu1 %624  ;;  %v623_v11 = vpop.permute.xlu0 %622 }
 0x155   : > { %v633_v13 = vpop.permute.xlu1 %632  ;;  %v631_v25 = vpop.permute.xlu0 %630 }
 0x159   : > { %v1002_v27 = vpop.permute.xlu1 %1001  ;;  %v1000_v54 = vpop.permute.xlu0 %999 }
 0x15d   : > { %v1010_v32 = vpop.permute.xlu1 %1009  ;;  %v1008_v48 = vpop.permute.xlu0 %1007 }
 0x15e   : > { %v1017_v43 = vsel %vm1015_vm11, %v1002_v27, %v1010_v32  ;;  %v1021_v44 = vsel %vm1015_vm11, %v1010_v32, %v1002_v27  ;;  %v1016_v33 = vsel %vm1015_vm11, %v1000_v54, %v1008_v48  ;;  %v1020_v21 = vsel %vm1015_vm11, %v1008_v48, %v1000_v54 }
 0x15f   : > { %v1046_v34 = vmul.f32 %v2923_v4, %v1017_v43  ;;  %v1047_v16 = vmul.f32 %v2923_v4, %v1021_v44  ;;  %v1044_v18 = vmul.f32 %v2925_v5, %v1016_v33  ;;  %v1045_v39 = vmul.f32 %v2925_v5, %v1020_v21  ;;  %v3905_v44 = vld [vmem:[#allocation12_spill] sm:$0xff] }
 0x160   : > { %v642_v43 = vsel %vm634_vm0, %v633_v13, %v625_v31  ;;  %v438_v33 = vmul.f32 %v3905_v44, %v411_v8 }
 0x161   : > { %v1065_v63 = vmul.f32 %v3254_v28, %v1046_v34  ;;  %v1066_v56 = vmul.f32 %v3257_v55, %v1047_v16  ;;  %v1063_v60 = vmul.f32 %v3254_v28, %v1044_v18  ;;  %v1064_v62 = vmul.f32 %v3257_v55, %v1045_v39  ;;  %v3275_v0 = vpop.permute.xlu1 %547  ;;  %v3277_v61 = vpop.permute.xlu0 %545 }
 0x162   : > { %v637_v16 = vsel %vm634_vm0, %v623_v11, %v631_v25 }
 0x163   : > { %v1073_v53 = vadd.f32 %v1065_v63, %v3165_v2  ;;  %v1074_v4 = vadd.f32 %v1066_v56, %v3167_v3  ;;  %v1071_v1 = vadd.f32 %v1063_v60, %v3169_v50  ;;  %v1072_v5 = vadd.f32 %v1064_v62, %v3171_v24  ;;  %v3908_v63 = vld [vmem:[#allocation16_spill] sm:$0xff] }
 0x164   : > { %v484_v3 = vsel %vm480_vm7, %v471_v35, %v479_v6  ;;  %v488_v50 = vsel %vm480_vm7, %v479_v6, %v471_v35  ;;  %v439_v35 = vmul.f32 %v3905_v44, %v407_v45  ;;  %v3906_v6 = vld [vmem:[#allocation14_spill] sm:$0xff]  ;;  %v3909_v56 = vld [vmem:[#allocation8_spill] sm:$0xff] }
 0x165   : > { %v556_v51 = vpop.permute.xlu1 %555  ;;  %v3283_v9 = vpop.permute.xlu0 %553  ;;  %v3285_v27 = vadd.f32 %v1082_v7, %v1074_v4  ;;  %v3287_v54 = vadd.f32 %v1081_v10, %v1073_v53  ;;  %v3289_v26 = vadd.f32 %v1080_v12, %v1072_v5  ;;  %v3291_v32 = vadd.f32 %v1079_v30, %v1071_v1  ;;  %v3910_v60 = vld [vmem:[#allocation20_spill] sm:$0xff]  ;;  %v3911_v53 = vld [vmem:[#allocation10_spill] sm:$0xff]  ;;  %v3912_v1 = vld [vmem:[#allocation9_spill] sm:$0xff] }
 0x166   : > { %v483_v10 = vsel %vm480_vm7, %v469_v42, %v477_v14  ;;  %v487_v12 = vsel %vm480_vm7, %v477_v14, %v469_v42  ;;  %v638_v30 = vsel %vm634_vm0, %v625_v31, %v633_v13  ;;  %v515_v21 = vmul.f32 %v3906_v6, %v488_v50  ;;  %v3907_v14 = vld [vmem:[#allocation15_spill] sm:$0xff]  ;;  %v3913_v5 = vld [vmem:[#allocation21_spill] sm:$0xff] }
 0x167   : > { %v516_v34 = vmul.f32 %v3906_v6, %v484_v3  ;;  %v641_v42 = vsel %vm634_vm0, %v631_v25, %v623_v11  ;;  %v513_v18 = vmul.f32 %v3907_v14, %v487_v12  ;;  %v514_v39 = vmul.f32 %v3907_v14, %v483_v10  ;;  %v3914_v11 = vld [vmem:[#allocation11_spill] sm:$0xff]  ;;  %v3915_v50 = vld [vmem:[#allocation13_spill] sm:$0xff] }
 0x168   : > { %v669_v31 = vmul.f32 %v3908_v63, %v642_v43  ;;  %v670_v8 = vmul.f32 %v3908_v63, %v638_v30  ;;  %v729_v62 = vmul.f32 %v3910_v60, %v3909_v56  ;;  %v730_v4 = vmul.f32 %v3910_v60, %v3911_v53  ;;  %v3916_v30 = vld [vmem:[#allocation17_spill] sm:$0xff] }
 0x169   : > { %v3293_v48 = vpop.permute.xlu1 %750  ;;  %v3295_v2 = vpop.permute.xlu0 %748  ;;  %v727_v3 = vmul.f32 %v3913_v5, %v3912_v1  ;;  %v728_v25 = vmul.f32 %v3913_v5, %v3914_v11  ;;  %v436_v10 = vmul.f32 %v3915_v50, %v3248_v36  ;;  %v437_v12 = vmul.f32 %v3915_v50, %v3244_v47 }
 0x16a   : > { %v667_v43 = vmul.f32 %v3916_v30, %v641_v42  ;;  %v668_v44 = vmul.f32 %v3916_v30, %v637_v16  ;;  %v457_v6 = vmul.f32 %v3059_v20, %v438_v33  ;;  %v458_v14 = vmul.f32 %v3062_v17, %v439_v35 }
 0x16b   : > { %v534_v63 = vmul.f32 %v3080_v46, %v515_v21  ;;  %v535_v56 = vmul.f32 %v3083_v38, %v516_v34  ;;  %v532_v60 = vmul.f32 %v3080_v46, %v513_v18  ;;  %v533_v53 = vmul.f32 %v3083_v38, %v514_v39 }
 0x16c   : > { %v688_v36 = vmul.f32 %v3086_v41, %v669_v31  ;;  %v689_v47 = vmul.f32 %v3089_v37, %v670_v8  ;;  %v455_v38 = vmul.f32 %v3059_v20, %v436_v10  ;;  %v456_v21 = vmul.f32 %v3062_v17, %v437_v12  ;;  %v3917_v8 = vld [vmem:[#allocation24_spill] sm:$0xff] }
 0x16d   : > { %v3301_v24 = vpop.permute.xlu1 %758  ;;  %v3303_v7 = vpop.permute.xlu0 %756  ;;  %v686_v34 = vmul.f32 %v3086_v41, %v667_v43  ;;  %v687_v18 = vmul.f32 %v3089_v37, %v668_v44  ;;  %v737_v39 = vadd.f32 %v729_v62, %v534_v63  ;;  %v738_v31 = vadd.f32 %v730_v4, %v535_v56 }
 0x16e   : > { %v561_v11 = vsel %vm557_vm6, %v3275_v0, %v556_v51  ;;  %v565_v20 = vsel %vm557_vm6, %v556_v51, %v3275_v0  ;;  %v735_v62 = vadd.f32 %v727_v3, %v532_v60  ;;  %v736_v4 = vadd.f32 %v728_v25, %v533_v53  ;;  %v3919_v51 = vld [vmem:[#allocation18_spill] sm:$0xff] }
 0x16f   : > { %v696_v10 = vadd.f32 %v688_v36, %v457_v6  ;;  %v697_v12 = vadd.f32 %v689_v47, %v458_v14  ;;  %v694_v30 = vadd.f32 %v686_v34, %v455_v38  ;;  %v695_v43 = vadd.f32 %v687_v18, %v456_v21 }
 0x170   : > { %v560_v44 = vsel %vm557_vm6, %v3277_v61, %v3283_v9  ;;  %v564_v0 = vsel %vm557_vm6, %v3283_v9, %v3277_v61  ;;  %v592_v63 = vmul.f32 %v3919_v51, %v565_v20  ;;  %v593_v56 = vmul.f32 %v3919_v51, %v561_v11 }
 0x171   : > { %v836_v13 = vpop.permute.xlu1 %835  ;;  %v834_v45 = vpop.permute.xlu0 %833  ;;  %v764_v6 = vsel %vm760_vm8, %v3293_v48, %v3301_v24  ;;  %v768_v14 = vsel %vm760_vm8, %v3301_v24, %v3293_v48  ;;  %v3921_v24 = vld [vmem:[#allocation27_spill] sm:$0xff] }
 0x175   : > { %v844_v1 = vpop.permute.xlu1 %843  ;;  %v842_v42 = vpop.permute.xlu0 %841 }
 0x176   : > { %v849_v16 = vsel %vm845_vm9, %v836_v13, %v844_v1  ;;  %v853_v33 = vsel %vm845_vm9, %v844_v1, %v836_v13  ;;  %v848_v35 = vsel %vm845_vm9, %v834_v45, %v842_v42  ;;  %v852_v46 = vsel %vm845_vm9, %v842_v42, %v834_v45  ;;  %v3918_v45 = vld [vmem:[#allocation25_spill] sm:$0xff] }
 0x177   : > { %v880_v5 = vmul.f32 %v3917_v8, %v849_v16  ;;  %v881_v13 = vmul.f32 %v3917_v8, %v853_v33  ;;  %v878_v17 = vmul.f32 %v3918_v45, %v848_v35  ;;  %v879_v41 = vmul.f32 %v3918_v45, %v852_v46  ;;  %v3920_v16 = vld [vmem:[#allocation26_spill] sm:$0xff] }
 0x178   : > { %v763_v35 = vsel %vm760_vm8, %v3295_v2, %v3303_v7  ;;  %v767_v46 = vsel %vm760_vm8, %v3303_v7, %v3295_v2 }
 0x179   : > { %v921_v50 = vpop.permute.xlu1 %920  ;;  %v919_v37 = vpop.permute.xlu0 %918  ;;  %v899_v3 = vmul.f32 %v3107_v23, %v880_v5  ;;  %v900_v25 = vmul.f32 %v3110_v15, %v881_v13  ;;  %v897_v61 = vmul.f32 %v3107_v23, %v878_v17  ;;  %v898_v9 = vmul.f32 %v3110_v15, %v879_v41 }
 0x17b   : > { %v907_v38 = vadd.f32 %v899_v3, %v696_v10  ;;  %v908_v21 = vadd.f32 %v900_v25, %v697_v12  ;;  %v905_v11 = vadd.f32 %v897_v61, %v694_v30  ;;  %v906_v20 = vadd.f32 %v898_v9, %v695_v43  ;;  %v3922_v10 = vld [vmem:[#allocation22_spill] sm:$0xff]  ;;  %v3923_v25 = vld [vmem:[#allocation23_spill] sm:$0xff] }
 0x17c   : > { %v795_v12 = vmul.f32 %v3922_v10, %v764_v6  ;;  %v3924_v6 = vld [vmem:[#allocation19_spill] sm:$0xff]  ;;  %v611_v61 = vmul.f32 %v3092_v49, %v592_v63  ;;  %v612_v9 = vmul.f32 %v3095_v29, %v593_v56 }
 0x17d   : > { %v929_v60 = vpop.permute.xlu1 %928  ;;  %v927_v53 = vpop.permute.xlu0 %926 }
 0x17e   : > { %v934_v36 = vsel %vm930_vm10, %v921_v50, %v929_v60  ;;  %v938_v47 = vsel %vm930_vm10, %v929_v60, %v921_v50  ;;  %v933_v1 = vsel %vm930_vm10, %v919_v37, %v927_v53  ;;  %v937_v42 = vsel %vm930_vm10, %v927_v53, %v919_v37 }
 0x17f   : > { %v965_v48 = vmul.f32 %v3920_v16, %v934_v36  ;;  %v966_v23 = vmul.f32 %v3920_v16, %v938_v47  ;;  %v963_v15 = vmul.f32 %v3921_v24, %v933_v1  ;;  %v964_v33 = vmul.f32 %v3921_v24, %v937_v42 }
 0x180   : > { %v814_v60 = vmul.f32 %v3100_v22, %v795_v12  ;;  %v1128_v12 = vld [vmem:[%s3839_s4 + $0x8] sm:$0xff] }
 0x181   : > { %v984_v34 = vmul.f32 %v3200_v58, %v965_v48  ;;  %v985_v18 = vmul.f32 %v3204_v59, %v966_v23  ;;  %v982_v8 = vmul.f32 %v3200_v58, %v963_v15  ;;  %v983_v5 = vmul.f32 %v3204_v59, %v964_v33  ;;  %v1107_v13 = vpop.permute.xlu1 %1106  ;;  %v1102_v2 = vpop.permute.xlu0 %1101 }
 0x182   : > { %v3416_v45 = vadd.f32 %v1107_v13, %v3287_v54  ;;  %v3419_v17 = vadd.f32 %v1107_v13, %v3285_v27  ;;  %v796_v58 = vmul.f32 %v3922_v10, %v768_v14  ;;  %v3424_v59 = vadd.f32 %v1102_v2, %v3291_v32 }
 0x183   : > { %v992_v7 = vadd.f32 %v984_v34, %v737_v39  ;;  %v993_v41 = vadd.f32 %v985_v18, %v738_v31  ;;  %v990_v50 = vadd.f32 %v982_v8, %v735_v62  ;;  %v991_v37 = vadd.f32 %v983_v5, %v736_v4 }
 0x184   : > { %v3427_v30 = vadd.f32 %v1102_v2, %v3289_v26  ;;  %v793_v39 = vmul.f32 %v3923_v25, %v763_v35  ;;  %v794_v31 = vmul.f32 %v3923_v25, %v767_v46  ;;  %v2171_v32 = vpack.c.bf16 %v3416_v45, %v3424_v59 }
 0x185   : > { %v1006_v54 = vpop.permute.xlu1 %1005  ;;  %v1085_v43 = vadd.f32 %v992_v7, %v907_v38  ;;  %v1086_v51 = vadd.f32 %v993_v41, %v908_v21  ;;  %v1083_v27 = vadd.f32 %v990_v50, %v905_v11  ;;  %v1084_v3 = vadd.f32 %v991_v37, %v906_v20  ;;  %v1004_v62 = vpop.permute.xlu0 %1003 }
 0x186   : > { %v2169_v4 = vpack.c.bf16 %v3419_v17, %v3427_v30  ;;  %v590_v14 = vmul.f32 %v3924_v6, %v564_v0  ;;  %v591_v26 = vmul.f32 %v3924_v6, %v560_v44  ;;  %v815_v53 = vmul.f32 %v3104_v40, %v796_v58  ;;  %v1129_v58 = vld [vmem:[%s3839_s4 + $0x10] sm:$0xff] }
 0x187   : > { %v812_v47 = vmul.f32 %v3100_v22, %v793_v39  ;;  %v813_v1 = vmul.f32 %v3104_v40, %v794_v31  ;;  %v822_v15 = vadd.f32 %v814_v60, %v611_v61 }
 0x188   : > { %2170 = vmatprep.subr.bf16.mxu1 %v2169_v4  ;;  %v609_v22 = vmul.f32 %v3092_v49, %v590_v14  ;;  %v610_v40 = vmul.f32 %v3095_v29, %v591_v26  ;;  %v823_v33 = vadd.f32 %v815_v53, %v612_v9 }
 0x189   : > { %2172 = vmatpush1.bf16.msra.mxu1 %v2171_v32  ;;  %v1014_v36 = vpop.permute.xlu1 %1013  ;;  %v1012_v42 = vpop.permute.xlu0 %1011 }
 0x18a   : > { %v1019_v0 = vsel %vm1015_vm11, %v1006_v54, %v1014_v36  ;;  %v1023_v44 = vsel %vm1015_vm11, %v1014_v36, %v1006_v54  ;;  %v1018_v16 = vsel %vm1015_vm11, %v1004_v62, %v1012_v42  ;;  %v1022_v48 = vsel %vm1015_vm11, %v1012_v42, %v1004_v62  ;;  %v1130_v54 = vld [vmem:[%s3839_s4 + $0x18] sm:$0xff] }
 0x18b   : > { %v1050_v63 = vmul.f32 %v3234_v57, %v1019_v0  ;;  %v1051_v56 = vmul.f32 %v3234_v57, %v1023_v44  ;;  %v1048_v23 = vmul.f32 %v3236_v52, %v1018_v16  ;;  %v1049_v24 = vmul.f32 %v3236_v52, %v1022_v48 }
 0x18c   : > { %v820_v46 = vadd.f32 %v812_v47, %v609_v22  ;;  %v821_v38 = vadd.f32 %v813_v1, %v610_v40 }
 0x18d   : > { %v1069_v35 = vmul.f32 %v3254_v28, %v1050_v63  ;;  %v1070_v57 = vmul.f32 %v3257_v55, %v1051_v56  ;;  %v1067_v21 = vmul.f32 %v3254_v28, %v1048_v23  ;;  %v1068_v19 = vmul.f32 %v3257_v55, %v1049_v24  ;;  %v1117_v13 = vpop.permute.xlu1 %1116  ;;  %v1127_v28 = vld [vmem:[%s3839_s4] sm:$0xff] }
 0x18e   : > { %v1112_v7 = vpop.permute.xlu0 %1111  ;;  %v3925_v55 = vmov 0.0  }
 0x18f   : > { %v1077_v34 = vadd.f32 %v1069_v35, %v822_v15  ;;  %v1078_v49 = vadd.f32 %v1070_v57, %v823_v33  ;;  %v1075_v18 = vadd.f32 %v1067_v21, %v820_v46  ;;  %v1076_v29 = vadd.f32 %v1068_v19, %v821_v38 }
 0x191   : > { %v1093_v8 = vadd.f32 %v1085_v43, %v1077_v34  ;;  %v1094_v5 = vadd.f32 %v1086_v51, %v1078_v49  ;;  %v1091_v52 = vadd.f32 %v1083_v27, %v1075_v18  ;;  %v1092_v11 = vadd.f32 %v1084_v3, %v1076_v29 }
 0x193   : > { %v1125_v20 = vadd.f32 %v1117_v13, %v1093_v8  ;;  %v1126_v2 = vadd.f32 %v1117_v13, %v1094_v5  ;;  %v1123_v41 = vadd.f32 %v1112_v7, %v1091_v52  ;;  %v1124_v50 = vadd.f32 %v1112_v7, %v1092_v11  ;;  %v1405_v7 = vld [vmem:[%s3841_s6 + $0x18] sm:$0xff] }
 0x195   : > { %v2173_v37 = vpack.c.bf16 %v1126_v2, %v1124_v50  ;;  %v2175_v10 = vpack.c.bf16 %v1125_v20, %v1123_v41 }
 0x197   : > { %2174 = vmatprep.subr.bf16.mxu1 %v2173_v37  ;;  %v1406_v37 = vld [vmem:[%s3841_s6 + $0x20] sm:$0xff] }
 0x198   : > { %2176 = vmatpush1.bf16.msra.mxu1 %v2175_v10  ;;  %v1409_v10 = vld [vmem:[%s3841_s6 + $0x38] sm:$0xff] }
 0x19b   : > { %2135 = vmatmul.mubr.msk.f32.vlgmr.msra.gmra.mrb[0].mxu1 %vm1131_vm12, %v1127_v28 }
 0x19c   : > { %1214 = vmatprep.mubr.f32.mxu1 %v3925_v55 }
 0x19f   : > { %2136 = vmatmul.mubr.msk.f32.gmra.mrb[2].mxu1 %vm1131_vm12, %v1128_v12 }
 0x1a0   : > { %1220 = vmatprep.mubr.f32.mxu1 %v3925_v55 }
 0x1a3   : > { %2137 = vmatmul.mubr.msk.f32.gmra.mrb[4].mxu1 %vm1131_vm12, %v1129_v58 }
 0x1a4   : > { %1226 = vmatprep.mubr.f32.mxu1 %v3925_v55 }
 0x1a7   : > { %2138 = vmatmul.mubr.msk.f32.gmra.mrb[6].mxu1 %vm1131_vm12, %v1130_v54 }
 0x1a8   : > { %1329 = vmatprep.mubr.f32.mxu1 %v3925_v55 }
 0x26e   : > { %v1210_v43 = vpop.f32.mrb[0].mxu1 }
 0x26f   : > { %v1212_v51 = vpop.f32.mrb[1].mxu1 }
 0x270   : > { %v1233_v27 = vadd.f32 %v1212_v51, %v1210_v43  ;;  %v1412_v43 = vld [vmem:[%s3841_s6 + $0x50] sm:$0xff]  ;;  %v1415_v51 = vld [vmem:[%s3841_s6 + $0x68] sm:$0xff] }
 0x272   : > { %1234 = vadd.xlane.f32.xlu0 %v1233_v27  ;;  %v1216_v3 = vpop.f32.mrb[2].mxu1  ;;  %v1414_v27 = vld [vmem:[%s3841_s6 + $0x60] sm:$0xff] }
 0x273   : > { %v1218_v25 = vpop.f32.mrb[3].mxu1 }
 0x274   : > { %v1236_v39 = vadd.f32 %v1218_v25, %v1216_v3  ;;  %v1417_v3 = vld [vmem:[%s3841_s6 + $0x78] sm:$0xff]  ;;  %v1416_v25 = vld [vmem:[%s3841_s6 + $0x70] sm:$0xff] }
 0x276   : > { %1237 = vadd.xlane.f32.xlu1 %v1236_v39  ;;  %v1222_v31 = vpop.f32.mrb[4].mxu1  ;;  %v1872_v39 = vld [vmem:[%s3843_s8 + $0x8] sm:$0xff] }
 0x277   : > { %v1224_v62 = vpop.f32.mrb[5].mxu1 }
 0x278   : > { %v1239_v4 = vadd.f32 %v1224_v62, %v1222_v31  ;;  %v1871_v31 = vld [vmem:[%s3843_s8] sm:$0xff]  ;;  %v1874_v62 = vld [vmem:[%s3843_s8 + $0x18] sm:$0xff] }
 0x27a   : > { %1240 = vadd.xlane.f32.xlu0 %v1239_v4  ;;  %v1228_v32 = vpop.f32.mrb[6].mxu1  ;;  %v1873_v4 = vld [vmem:[%s3843_s8 + $0x10] sm:$0xff] }
 0x27b   : > { %v1230_v6 = vpop.f32.mrb[7].mxu1 }
 0x27c   : > { %v1242_v14 = vadd.f32 %v1230_v6, %v1228_v32 }
 0x27e   : > { %1243 = vadd.xlane.f32.xlu0 %v1242_v14 }
 0x2ff   : > { %v1235_v26 = vpop.xlane.xlu0 %1234 }
 0x300   : > { %v1245_v61 = vmul.f32 0.0009765625, %v1235_v26 }
 0x302   : > { %v3482_v9 = vsub.f32 %v3424_v59, %v1245_v61  ;;  %v3485_v53 = vsub.f32 %v3427_v30, %v1245_v61 }
 0x303   : > { %v1238_v60 = vpop.xlane.xlu1 %1237 }
 0x304   : > { %v1246_v36 = vmul.f32 0.0009765625, %v1238_v60  ;;  %v1257_v0 = vmul.f32 %v3482_v9, %v3482_v9  ;;  %v1258_v42 = vmul.f32 %v3485_v53, %v3485_v53 }
 0x306   : > { %v3488_v47 = vsub.f32 %v3416_v45, %v1246_v36  ;;  %v3491_v1 = vsub.f32 %v3419_v17, %v1246_v36 }
 0x307   : > { %v1241_v44 = vpop.xlane.xlu0 %1240 }
 0x308   : > { %v1259_v59 = vmul.f32 %v3488_v47, %v3488_v47  ;;  %v1260_v30 = vmul.f32 %v3491_v1, %v3491_v1  ;;  %v1247_v63 = vmul.f32 0.0009765625, %v1241_v44 }
 0x30a   : > { %v2179_v56 = vpack.c.bf16 %v1259_v59, %v1257_v0  ;;  %v2177_v45 = vpack.c.bf16 %v1260_v30, %v1258_v42  ;;  %v3501_v48 = vsub.f32 %v1123_v41, %v1247_v63  ;;  %v3503_v17 = vsub.f32 %v1124_v50, %v1247_v63  ;;  %v1403_v41 = vld [vmem:[%s3841_s6 + $0x8] sm:$0xff] }
 0x30b   : > { %v1244_v16 = vpop.xlane.xlu0 %1243  ;;  %v1407_v50 = vld [vmem:[%s3841_s6 + $0x28] sm:$0xff] }
 0x30c   : > { %v1248_v22 = vmul.f32 0.0009765625, %v1244_v16  ;;  %2178 = vmatprep.subr.bf16.mxu1 %v2177_v45  ;;  %v1261_v24 = vmul.f32 %v3501_v48, %v3501_v48  ;;  %v1262_v15 = vmul.f32 %v3503_v17, %v3503_v17 }
 0x30d   : > { %2180 = vmatpush1.bf16.msra.mxu1 %v2179_v56 }
 0x30e   : > { %v3505_v40 = vsub.f32 %v1125_v20, %v1248_v22  ;;  %v3507_v23 = vsub.f32 %v1126_v2, %v1248_v22  ;;  %v1402_v20 = vld [vmem:[%s3841_s6] sm:$0xff]  ;;  %v1404_v2 = vld [vmem:[%s3841_s6 + $0x10] sm:$0xff] }
 0x310   : > { %v1263_v33 = vmul.f32 %v3505_v40, %v3505_v40  ;;  %v1264_v35 = vmul.f32 %v3507_v23, %v3507_v23 }
 0x312   : > { %v2183_v57 = vpack.c.bf16 %v1263_v33, %v1261_v24  ;;  %v2181_v46 = vpack.c.bf16 %v1264_v35, %v1262_v15 }
 0x314   : > { %2182 = vmatprep.subr.bf16.mxu1 %v2181_v46 }
 0x315   : > { %2184 = vmatpush1.bf16.msra.mxu1 %v2183_v57 }
 0x318   : > { %2139 = vmatmul.mubr.msk.f32.vlgmr.msra.gmra.mrb[8].mxu1 %vm1131_vm12, %v1127_v28  ;;  %v1408_v28 = vld [vmem:[%s3841_s6 + $0x30] sm:$0xff] }
 0x319   : > { %1335 = vmatprep.mubr.f32.mxu1 %v3925_v55 }
 0x31c   : > { %2140 = vmatmul.mubr.msk.f32.gmra.mrb[10].mxu1 %vm1131_vm12, %v1128_v12  ;;  %v1411_v12 = vld [vmem:[%s3841_s6 + $0x48] sm:$0xff] }
 0x31d   : > { %1341 = vmatprep.mubr.f32.mxu1 %v3925_v55 }
 0x320   : > { %2141 = vmatmul.mubr.msk.f32.gmra.mrb[12].mxu1 %vm1131_vm12, %v1129_v58  ;;  %v1410_v58 = vld [vmem:[%s3841_s6 + $0x40] sm:$0xff] }
 0x321   : > { %1347 = vmatprep.mubr.f32.mxu1 %v3925_v55 }
 0x324   : > { %2142 = vmatmul.mubr.msk.f32.gmra.mrb[14].mxu1 %vm1131_vm12, %v1130_v54  ;;  %v1413_v54 = vld [vmem:[%s3841_s6 + $0x58] sm:$0xff] }
 0x325   : > { %1959 = vmatprep.mubr.f32.mxu1 %v3925_v55 }
 0x3eb   : > { %v1331_v38 = vpop.f32.mrb[8].mxu1 }
 0x3ec   : > { %v1333_v21 = vpop.f32.mrb[9].mxu1 }
 0x3ed   : > { %v1354_v19 = vadd.f32 %v1333_v21, %v1331_v38 }
 0x3ef   : > { %1355 = vadd.xlane.f32.xlu1 %v1354_v19  ;;  %v1337_v34 = vpop.f32.mrb[10].mxu1 }
 0x3f0   : > { %v1339_v49 = vpop.f32.mrb[11].mxu1 }
 0x3f1   : > { %v1357_v18 = vadd.f32 %v1339_v49, %v1337_v34  ;;  %v1392_v34 = vld [vmem:[%s3840_s5 + $0x30] sm:$0xff]  ;;  %v1393_v49 = vld [vmem:[%s3840_s5 + $0x38] sm:$0xff] }
 0x3f3   : > { %1358 = vadd.xlane.f32.xlu0 %v1357_v18  ;;  %v1343_v29 = vpop.f32.mrb[12].mxu1  ;;  %v1394_v18 = vld [vmem:[%s3840_s5 + $0x40] sm:$0xff] }
 0x3f4   : > { %v1345_v8 = vpop.f32.mrb[13].mxu1 }
 0x3f5   : > { %v1360_v5 = vadd.f32 %v1345_v8, %v1343_v29  ;;  %v1395_v29 = vld [vmem:[%s3840_s5 + $0x48] sm:$0xff]  ;;  %v1396_v8 = vld [vmem:[%s3840_s5 + $0x50] sm:$0xff] }
 0x3f7   : > { %1361 = vadd.xlane.f32.xlu1 %v1360_v5  ;;  %v1349_v13 = vpop.f32.mrb[14].mxu1  ;;  %v1397_v5 = vld [vmem:[%s3840_s5 + $0x58] sm:$0xff] }
 0x3f8   : > { %v1351_v52 = vpop.f32.mrb[15].mxu1 }
 0x3f9   : > { %v1363_v11 = vadd.f32 %v1351_v52, %v1349_v13  ;;  %v1398_v13 = vld [vmem:[%s3840_s5 + $0x60] sm:$0xff]  ;;  %v1399_v52 = vld [vmem:[%s3840_s5 + $0x68] sm:$0xff] }
 0x3fb   : > { %1364 = vadd.xlane.f32.xlu0 %v1363_v11  ;;  %v1400_v11 = vld [vmem:[%s3840_s5 + $0x70] sm:$0xff] }
 0x408   : > { %1420 = vperm.xlu1 %2285, %v1402_v20   ;;  %v1401_v20 = vld [vmem:[%s3840_s5 + $0x78] sm:$0xff] }
 0x40c   : > { %1430 = vperm.xlu1 %2285, %v1404_v2  }
 0x410   : > { %1435 = vperm.xlu1 %2285, %v1405_v7  }
 0x411   : > { %1425 = vperm.xlu0 %2284, %v1403_v41  }
 0x414   : > { %1445 = vperm.xlu1 %2285, %v1407_v50  }
 0x415   : > { %1440 = vperm.xlu0 %2284, %v1406_v37  }
 0x418   : > { %1455 = vperm.xlu1 %2285, %v1409_v10  }
 0x419   : > { %1450 = vperm.xlu0 %2284, %v1408_v28  }
 0x41c   : > { %1465 = vperm.xlu1 %2285, %v1411_v12  }
 0x41d   : > { %1460 = vperm.xlu0 %2284, %v1410_v58  }
 0x420   : > { %1475 = vperm.xlu1 %2285, %v1413_v54  }
 0x421   : > { %1470 = vperm.xlu0 %2284, %v1412_v43  }
 0x424   : > { %1485 = vperm.xlu1 %2285, %v1415_v51  }
 0x425   : > { %1480 = vperm.xlu0 %2284, %v1414_v27  }
 0x428   : > { %1495 = vperm.xlu1 %2285, %v1417_v3  }
 0x429   : > { %1490 = vperm.xlu0 %2284, %v1416_v25  }
 0x42c   : > { %1882 = vperm.xlu1 %2285, %v1872_v39  }
 0x42d   : > { %1877 = vperm.xlu0 %2284, %v1871_v31  }
 0x430   : > { %1892 = vperm.xlu1 %2285, %v1874_v62  }
 0x431   : > { %1887 = vperm.xlu0 %2284, %v1873_v4  }
 0x47c   : > { %v1356_v32 = vpop.xlane.xlu1 %1355 }
 0x47d   : > { %v1366_v6 = vmul.f32 0.0009765625, %v1356_v32 }
 0x47f   : > { %v1370_v14 = vadd.f32 1e-05, %v1366_v6 }
 0x480   : > { %v1359_v26 = vpop.xlane.xlu0 %1358 }
 0x481   : > { %v1367_v61 = vmul.f32 0.0009765625, %v1359_v26  ;;  %2286 = vrsqrt.f32 %v1370_v14 }
 0x483   : > { %v1371_v60 = vadd.f32 1e-05, %v1367_v61 }
 0x484   : > { %v1362_v36 = vpop.xlane.xlu1 %1361 }
 0x485   : > { %2288 = vrsqrt.f32 %v1371_v60  ;;  %v1368_v0 = vmul.f32 0.0009765625, %v1362_v36 }
 0x487   : > { %v1372_v44 = vadd.f32 1e-05, %v1368_v0 }
 0x488   : > { %v1365_v42 = vpop.xlane.xlu0 %1364  ;;  %v1421_v2 = vpop.permute.xlu1 %1420 }
 0x489   : > { %v1369_v59 = vmul.f32 0.0009765625, %v1365_v42  ;;  %2290 = vrsqrt.f32 %v1372_v44 }
 0x48b   : > { %v1373_v30 = vadd.f32 1e-05, %v1369_v59  ;;  %v2287_v63 = vpop.eup %2286 }
 0x48c   : > { %v1379_v45 = vmul.f32 %v2287_v63, %v3485_v53  ;;  %v1378_v22 = vmul.f32 %v2287_v63, %v3482_v9  ;;  %v1386_v9 = vld [vmem:[%s3840_s5] sm:$0xff]  ;;  %v1431_v51 = vpop.permute.xlu1 %1430 }
 0x48d   : > { %2292 = vrsqrt.f32 %v1373_v30 }
 0x48f   : > { %v2289_v56 = vpop.eup %2288 }
 0x490   : > { %v1381_v16 = vmul.f32 %v2289_v56, %v3491_v1  ;;  %v1380_v24 = vmul.f32 %v2289_v56, %v3488_v47  ;;  %v1387_v47 = vld [vmem:[%s3840_s5 + $0x8] sm:$0xff]  ;;  %v1426_v28 = vpop.permute.xlu0 %1425  ;;  %v1436_v6 = vpop.permute.xlu1 %1435 }
 0x492   : > { %v2185_v15 = vpack.c.bf16 %v1381_v16, %v1379_v45  ;;  %v2187_v33 = vpack.c.bf16 %v1380_v24, %v1378_v22 }
 0x493   : > { %v2291_v35 = vpop.eup %2290 }
 0x494   : > { %2186 = vmatprep.subr.bf16.mxu0 %v2185_v15  ;;  %v1383_v46 = vmul.f32 %v2291_v35, %v3503_v17  ;;  %v1382_v21 = vmul.f32 %v2291_v35, %v3501_v48  ;;  %v1388_v48 = vld [vmem:[%s3840_s5 + $0x10] sm:$0xff]  ;;  %v1389_v17 = vld [vmem:[%s3840_s5 + $0x18] sm:$0xff]  ;;  %v1441_v59 = vpop.permute.xlu0 %1440 }
 0x495   : > { %2188 = vmatpush1.bf16.msra.mxu0 %v2187_v33 }
 0x497   : > { %v2293_v57 = vpop.eup %2292 }
 0x498   : > { %v1385_v38 = vmul.f32 %v2293_v57, %v3507_v23  ;;  %v1384_v53 = vmul.f32 %v2293_v57, %v3505_v40  ;;  %v1390_v40 = vld [vmem:[%s3840_s5 + $0x20] sm:$0xff]  ;;  %v1391_v23 = vld [vmem:[%s3840_s5 + $0x28] sm:$0xff] }
 0x49a   : > { %v2189_v19 = vpack.c.bf16 %v1385_v38, %v1383_v46  ;;  %v2191_v1 = vpack.c.bf16 %v1384_v53, %v1382_v21  ;;  %v1446_v46 = vpop.permute.xlu1 %1445 }
 0x49c   : > { %2190 = vmatprep.subr.bf16.mxu0 %v2189_v19 }
 0x49d   : > { %2192 = vmatpush1.bf16.msra.mxu0 %v2191_v1 }
 0x4a0   : > { %2143 = vmatmul.mubr.msk.f32.vlgmr.msra.gmra.mrb[0].mxu0 %vm1131_vm12, %v1386_v9 }
 0x4a1   : > { %1616 = vmatprep.mubr.f32.mxu0 %v3925_v55 }
 0x4a4   : > { %2144 = vmatmul.mubr.msk.f32.gmra.mrb[2].mxu0 %vm1131_vm12, %v1387_v47 }
 0x4a5   : > { %1622 = vmatprep.mubr.f32.mxu0 %v3925_v55 }
 0x4a8   : > { %2145 = vmatmul.mubr.msk.f32.gmra.mrb[4].mxu0 %vm1131_vm12, %v1388_v48 }
 0x4a9   : > { %1628 = vmatprep.mubr.f32.mxu0 %v3925_v55 }
 0x4ac   : > { %2146 = vmatmul.mubr.msk.f32.gmra.mrb[6].mxu0 %vm1131_vm12, %v1389_v17 }
 0x4ad   : > { %1634 = vmatprep.mubr.f32.mxu0 %v3925_v55 }
 0x4b0   : > { %2147 = vmatmul.mubr.msk.f32.gmra.mrb[8].mxu0 %vm1131_vm12, %v1390_v40 }
 0x4b1   : > { %1640 = vmatprep.mubr.f32.mxu0 %v3925_v55 }
 0x4b4   : > { %2148 = vmatmul.mubr.msk.f32.gmra.mrb[10].mxu0 %vm1131_vm12, %v1391_v23 }
 0x4b5   : > { %1646 = vmatprep.mubr.f32.mxu0 %v3925_v55 }
 0x4b8   : > { %2149 = vmatmul.mubr.msk.f32.gmra.mrb[12].mxu0 %vm1131_vm12, %v1392_v34 }
 0x4b9   : > { %1652 = vmatprep.mubr.f32.mxu0 %v3925_v55 }
 0x4bc   : > { %2150 = vmatmul.mubr.msk.f32.gmra.mrb[14].mxu0 %vm1131_vm12, %v1393_v49 }
 0x4bd   : > { %1658 = vmatprep.mubr.f32.mxu0 %v3925_v55 }
 0x4c0   : > { %2151 = vmatmul.mubr.msk.f32.gmra.mrb[16].mxu0 %vm1131_vm12, %v1394_v18 }
 0x4c1   : > { %1664 = vmatprep.mubr.f32.mxu0 %v3925_v55 }
 0x4c4   : > { %2152 = vmatmul.mubr.msk.f32.gmra.mrb[18].mxu0 %vm1131_vm12, %v1395_v29 }
 0x4c5   : > { %1670 = vmatprep.mubr.f32.mxu0 %v3925_v55 }
 0x4c8   : > { %2153 = vmatmul.mubr.msk.f32.gmra.mrb[20].mxu0 %vm1131_vm12, %v1396_v8 }
 0x4c9   : > { %1676 = vmatprep.mubr.f32.mxu0 %v3925_v55 }
 0x4cc   : > { %2154 = vmatmul.mubr.msk.f32.gmra.mrb[22].mxu0 %vm1131_vm12, %v1397_v5 }
 0x4cd   : > { %1682 = vmatprep.mubr.f32.mxu0 %v3925_v55 }
 0x4d0   : > { %2155 = vmatmul.mubr.msk.f32.gmra.mrb[24].mxu0 %vm1131_vm12, %v1398_v13  ;;  %v1451_v13 = vpop.permute.xlu0 %1450 }
 0x4d1   : > { %1688 = vmatprep.mubr.f32.mxu0 %v3925_v55 }
 0x4d4   : > { %2156 = vmatmul.mubr.msk.f32.gmra.mrb[26].mxu0 %vm1131_vm12, %v1399_v52 }
 0x4d5   : > { %1694 = vmatprep.mubr.f32.mxu0 %v3925_v55 }
 0x4d8   : > { %2157 = vmatmul.mubr.msk.f32.gmra.mrb[28].mxu0 %vm1131_vm12, %v1400_v11 }
 0x4d9   : > { %1700 = vmatprep.mubr.f32.mxu0 %v3925_v55 }
 0x4dc   : > { %2158 = vmatmul.mubr.msk.f32.gmra.mrb[30].mxu0 %vm1131_vm12, %v1401_v20 }
 0x573   : > { %v1612_v7 = vpop.f32.mrb[0].mxu0 }
 0x574   : > { %v1613_v41 = vadd.f32 %v1612_v7, %v1421_v2  ;;  %v1614_v50 = vpop.f32.mrb[1].mxu0 }
 0x575   : > { %v1615_v37 = vadd.f32 %v1614_v50, %v1421_v2 }
 0x576   : > { %v1739_v10 = vmul.f32 0.70710677, %v1613_v41  ;;  %v1707_v15 = vmul.f32 0.5, %v1613_v41 }
 0x577   : > { %v1740_v12 = vmul.f32 0.70710677, %v1615_v37  ;;  %v1618_v58 = vpop.f32.mrb[2].mxu0  ;;  %v1708_v38 = vmul.f32 0.5, %v1615_v37 }
 0x578   : > { %2294 = verf.f32 %v1739_v10  ;;  %v1619_v54 = vadd.f32 %v1618_v58, %v1426_v28  ;;  %v1620_v43 = vpop.f32.mrb[3].mxu0 }
 0x579   : > { %2296 = verf.f32 %v1740_v12  ;;  %v1621_v27 = vadd.f32 %v1620_v43, %v1426_v28  ;;  %v1456_v43 = vpop.permute.xlu1 %1455 }
 0x57a   : > { %v1741_v3 = vmul.f32 0.70710677, %v1619_v54  ;;  %v1709_v21 = vmul.f32 0.5, %v1619_v54 }
 0x57b   : > { %v1742_v25 = vmul.f32 0.70710677, %v1621_v27  ;;  %v1624_v39 = vpop.f32.mrb[4].mxu0  ;;  %v1710_v9 = vmul.f32 0.5, %v1621_v27 }
 0x57c   : > { %2298 = verf.f32 %v1741_v3  ;;  %v1625_v31 = vadd.f32 %v1624_v39, %v1431_v51  ;;  %v1626_v62 = vpop.f32.mrb[5].mxu0 }
 0x57d   : > { %2300 = verf.f32 %v1742_v25  ;;  %v3672_v4 = vadd.f32 %v1626_v62, %v1431_v51 }
 0x57e   : > { %v1743_v32 = vmul.f32 0.70710677, %v1625_v31  ;;  %v1711_v28 = vmul.f32 0.5, %v1625_v31 }
 0x57f   : > { %v1744_v14 = vmul.f32 0.70710677, %v3672_v4  ;;  %v1630_v26 = vpop.f32.mrb[6].mxu0  ;;  %v1712_v51 = vmul.f32 0.5, %v3672_v4 }
 0x580   : > { %2302 = verf.f32 %v1743_v32  ;;  %v1631_v61 = vadd.f32 %v1630_v26, %v1436_v6  ;;  %v1632_v60 = vpop.f32.mrb[7].mxu0 }
 0x581   : > { %2304 = verf.f32 %v1744_v14  ;;  %v1633_v36 = vadd.f32 %v1632_v60, %v1436_v6 }
 0x582   : > { %v2295_v0 = vpop.eup %2294  ;;  %v1745_v44 = vmul.f32 0.70710677, %v1631_v61  ;;  %v1713_v27 = vmul.f32 0.5, %v1631_v61 }
 0x583   : > { %v2297_v42 = vpop.eup %2296  ;;  %v1746_v30 = vmul.f32 0.70710677, %v1633_v36  ;;  %v1636_v63 = vpop.f32.mrb[8].mxu0  ;;  %v1803_v16 = vadd.f32 1.0, %v2295_v0  ;;  %v1714_v62 = vmul.f32 0.5, %v1633_v36 }
 0x584   : > { %2306 = verf.f32 %v1745_v44  ;;  %v3675_v56 = vadd.f32 %v1636_v63, %v1441_v59  ;;  %v1638_v45 = vpop.f32.mrb[9].mxu0  ;;  %v1804_v33 = vadd.f32 1.0, %v2297_v42 }
 0x585   : > { %2308 = verf.f32 %v1746_v30  ;;  %v3677_v22 = vadd.f32 %v1638_v45, %v1441_v59  ;;  %v1835_v40 = vmul.f32 %v1803_v16, %v1707_v15  ;;  %v1461_v59 = vpop.permute.xlu0 %1460 }
 0x586   : > { %v2299_v24 = vpop.eup %2298  ;;  %v1747_v35 = vmul.f32 0.70710677, %v3675_v56  ;;  %v1836_v18 = vmul.f32 %v1804_v33, %v1708_v38 }
 0x587   : > { %v2301_v57 = vpop.eup %2300  ;;  %v1805_v53 = vadd.f32 1.0, %v2299_v24  ;;  %v1748_v19 = vmul.f32 0.70710677, %v3677_v22  ;;  %v1642_v1 = vpop.f32.mrb[10].mxu0 }
 0x588   : > { %v1806_v47 = vadd.f32 1.0, %v2301_v57  ;;  %2310 = verf.f32 %v1747_v35  ;;  %v3681_v48 = vadd.f32 %v1642_v1, %v1446_v46  ;;  %v1644_v17 = vpop.f32.mrb[11].mxu0  ;;  %v1715_v57 = vmul.f32 0.5, %v3675_v56 }
 0x589   : > { %v1837_v23 = vmul.f32 %v1805_v53, %v1709_v21  ;;  %2312 = verf.f32 %v1748_v19  ;;  %v3683_v34 = vadd.f32 %v1644_v17, %v1446_v46  ;;  %v1466_v53 = vpop.permute.xlu1 %1465  ;;  %v1716_v19 = vmul.f32 0.5, %v3677_v22 }
 0x58a   : > { %v2303_v49 = vpop.eup %2302  ;;  %v1838_v29 = vmul.f32 %v1806_v47, %v1710_v9  ;;  %v1749_v8 = vmul.f32 0.70710677, %v3681_v48  ;;  %v1717_v1 = vmul.f32 0.5, %v3681_v48 }
 0x58b   : > { %v2305_v5 = vpop.eup %2304  ;;  %v2195_v52 = vpack.c.bf16 %v1837_v23, %v1835_v40  ;;  %v1750_v11 = vmul.f32 0.70710677, %v3683_v34  ;;  %v1648_v20 = vpop.f32.mrb[12].mxu0  ;;  %v1807_v50 = vadd.f32 1.0, %v2303_v49  ;;  %v1718_v40 = vmul.f32 0.5, %v3683_v34 }
 0x58c   : > { %2314 = verf.f32 %v1749_v8  ;;  %v3687_v2 = vadd.f32 %v1648_v20, %v1451_v13  ;;  %v1650_v7 = vpop.f32.mrb[13].mxu0  ;;  %v2193_v41 = vpack.c.bf16 %v1838_v29, %v1836_v18  ;;  %v1808_v12 = vadd.f32 1.0, %v2305_v5 }
 0x58d   : > { %2316 = verf.f32 %v1750_v11  ;;  %v3689_v37 = vadd.f32 %v1650_v7, %v1451_v13  ;;  %v1839_v14 = vmul.f32 %v1807_v50, %v1711_v28  ;;  %v1471_v11 = vpop.permute.xlu0 %1470 }
 0x58e   : > { %v2307_v10 = vpop.eup %2306  ;;  %v1751_v58 = vmul.f32 0.70710677, %v3687_v2  ;;  %2194 = vmatprep.subr.bf16.mxu1 %v2193_v41  ;;  %v1840_v44 = vmul.f32 %v1808_v12, %v1712_v51 }
 0x58f   : > { %v2309_v54 = vpop.eup %2308  ;;  %v1809_v3 = vadd.f32 1.0, %v2307_v10  ;;  %v1752_v25 = vmul.f32 0.70710677, %v3689_v37  ;;  %v1654_v39 = vpop.f32.mrb[14].mxu0  ;;  %2196 = vmatpush1.bf16.msra.mxu1 %v2195_v52 }
 0x590   : > { %v1810_v32 = vadd.f32 1.0, %v2309_v54  ;;  %2318 = verf.f32 %v1751_v58  ;;  %v3694_v6 = vadd.f32 %v1654_v39, %v1456_v43  ;;  %v1656_v31 = vpop.f32.mrb[15].mxu0  ;;  %v1719_v54 = vmul.f32 0.5, %v3687_v2 }
 0x591   : > { %v1841_v26 = vmul.f32 %v1809_v3, %v1713_v27  ;;  %2320 = verf.f32 %v1752_v25  ;;  %v3696_v60 = vadd.f32 %v1656_v31, %v1456_v43  ;;  %v1476_v3 = vpop.permute.xlu1 %1475  ;;  %v1720_v25 = vmul.f32 0.5, %v3689_v37 }
 0x592   : > { %v2311_v0 = vpop.eup %2310  ;;  %v1842_v4 = vmul.f32 %v1810_v32, %v1714_v62  ;;  %v1753_v61 = vmul.f32 0.70710677, %v3694_v6  ;;  %v1721_v39 = vmul.f32 0.5, %v3694_v6 }
 0x593   : > { %v2313_v42 = vpop.eup %2312  ;;  %v2199_v30 = vpack.c.bf16 %v1841_v26, %v1839_v14  ;;  %v1754_v36 = vmul.f32 0.70710677, %v3696_v60  ;;  %v1660_v63 = vpop.f32.mrb[16].mxu0  ;;  %v1811_v15 = vadd.f32 1.0, %v2311_v0  ;;  %v1722_v14 = vmul.f32 0.5, %v3696_v60 }
 0x594   : > { %2322 = verf.f32 %v1753_v61  ;;  %v3700_v45 = vadd.f32 %v1660_v63, %v1461_v59  ;;  %v1662_v16 = vpop.f32.mrb[17].mxu0  ;;  %v2197_v24 = vpack.c.bf16 %v1842_v4, %v1840_v44  ;;  %v1812_v46 = vadd.f32 1.0, %v2313_v42 }
 0x595   : > { %2324 = verf.f32 %v1754_v36  ;;  %v3702_v33 = vadd.f32 %v1662_v16, %v1461_v59  ;;  %v1843_v18 = vmul.f32 %v1811_v15, %v1715_v57  ;;  %v1481_v36 = vpop.permute.xlu0 %1480 }
 0x596   : > { %v2315_v35 = vpop.eup %2314  ;;  %v1755_v38 = vmul.f32 0.70710677, %v3700_v45  ;;  %2198 = vmatprep.subr.bf16.mxu1 %v2197_v24  ;;  %v1844_v5 = vmul.f32 %v1812_v46, %v1716_v19 }
 0x597   : > { %v2317_v21 = vpop.eup %2316  ;;  %v1813_v9 = vadd.f32 1.0, %v2315_v35  ;;  %v1756_v47 = vmul.f32 0.70710677, %v3702_v33  ;;  %v1666_v17 = vpop.f32.mrb[18].mxu0  ;;  %2200 = vmatpush1.bf16.msra.mxu1 %v2199_v30 }
 0x598   : > { %v1814_v23 = vadd.f32 1.0, %v2317_v21  ;;  %2326 = verf.f32 %v1755_v38  ;;  %v3710_v56 = vadd.f32 %v1666_v17, %v1466_v53  ;;  %v1668_v49 = vpop.f32.mrb[19].mxu0  ;;  %v1723_v21 = vmul.f32 0.5, %v3700_v45 }
 0x599   : > { %v1845_v29 = vmul.f32 %v1813_v9, %v1717_v1  ;;  %2328 = verf.f32 %v1756_v47  ;;  %v3712_v8 = vadd.f32 %v1668_v49, %v1466_v53  ;;  %v1486_v9 = vpop.permute.xlu1 %1485  ;;  %v1724_v47 = vmul.f32 0.5, %v3702_v33 }
 0x59a   : > { %v2319_v22 = vpop.eup %2318  ;;  %v1846_v48 = vmul.f32 %v1814_v23, %v1718_v40  ;;  %v1757_v13 = vmul.f32 0.70710677, %v3710_v56  ;;  %v1725_v17 = vmul.f32 0.5, %v3710_v56 }
 0x59b   : > { %v2321_v52 = vpop.eup %2320  ;;  %v2203_v20 = vpack.c.bf16 %v1845_v29, %v1843_v18  ;;  %v1758_v34 = vmul.f32 0.70710677, %v3712_v8  ;;  %v1672_v7 = vpop.f32.mrb[20].mxu0  ;;  %v1815_v28 = vadd.f32 1.0, %v2319_v22  ;;  %v1726_v18 = vmul.f32 0.5, %v3712_v8 }
 0x59c   : > { %2330 = verf.f32 %v1757_v13  ;;  %v3716_v41 = vadd.f32 %v1672_v7, %v1471_v11  ;;  %v1674_v50 = vpop.f32.mrb[21].mxu0  ;;  %v2201_v10 = vpack.c.bf16 %v1846_v48, %v1844_v5  ;;  %v1816_v43 = vadd.f32 1.0, %v2321_v52 }
 0x59d   : > { %2332 = verf.f32 %v1758_v34  ;;  %v3718_v12 = vadd.f32 %v1674_v50, %v1471_v11  ;;  %v1847_v44 = vmul.f32 %v1815_v28, %v1719_v54  ;;  %v1491_v34 = vpop.permute.xlu0 %1490 }
 0x59e   : > { %v2323_v58 = vpop.eup %2322  ;;  %v1759_v51 = vmul.f32 0.70710677, %v3716_v41  ;;  %2202 = vmatprep.subr.bf16.mxu1 %v2201_v10  ;;  %v1848_v42 = vmul.f32 %v1816_v43, %v1720_v25 }
 0x59f   : > { %v2325_v27 = vpop.eup %2324  ;;  %v1817_v62 = vadd.f32 1.0, %v2323_v58  ;;  %v1760_v32 = vmul.f32 0.70710677, %v3718_v12  ;;  %v1678_v31 = vpop.f32.mrb[22].mxu0  ;;  %2204 = vmatpush1.bf16.msra.mxu1 %v2203_v20 }
 0x5a0   : > { %v1818_v26 = vadd.f32 1.0, %v2325_v27  ;;  %2334 = verf.f32 %v1759_v51  ;;  %v3726_v2 = vadd.f32 %v1678_v31, %v1476_v3  ;;  %v1680_v0 = vpop.f32.mrb[23].mxu0  ;;  %v1727_v27 = vmul.f32 0.5, %v3716_v41 }
 0x5a1   : > { %v1849_v4 = vmul.f32 %v1817_v62, %v1721_v39  ;;  %2336 = verf.f32 %v1760_v32  ;;  %v3728_v61 = vadd.f32 %v1680_v0, %v1476_v3  ;;  %v1496_v62 = vpop.permute.xlu1 %1495  ;;  %v1728_v32 = vmul.f32 0.5, %v3718_v12 }
 0x5a2   : > { %v2327_v37 = vpop.eup %2326  ;;  %v1850_v6 = vmul.f32 %v1818_v26, %v1722_v14  ;;  %v1761_v59 = vmul.f32 0.70710677, %v3726_v2  ;;  %v1729_v31 = vmul.f32 0.5, %v3726_v2 }
 0x5a3   : > { %v2329_v30 = vpop.eup %2328  ;;  %v2207_v63 = vpack.c.bf16 %v1849_v4, %v1847_v44  ;;  %v1762_v60 = vmul.f32 0.70710677, %v3728_v61  ;;  %v1684_v16 = vpop.f32.mrb[24].mxu0  ;;  %v1819_v57 = vadd.f32 1.0, %v2327_v37  ;;  %v1730_v44 = vmul.f32 0.5, %v3728_v61 }
 0x5a4   : > { %2338 = verf.f32 %v1761_v59  ;;  %v3732_v24 = vadd.f32 %v1684_v16, %v1481_v36  ;;  %v1686_v15 = vpop.f32.mrb[25].mxu0  ;;  %v2205_v35 = vpack.c.bf16 %v1850_v6, %v1848_v42  ;;  %v1820_v53 = vadd.f32 1.0, %v2329_v30 }
 0x5a5   : > { %2340 = verf.f32 %v1762_v60  ;;  %v3734_v46 = vadd.f32 %v1686_v15, %v1481_v36  ;;  %v1851_v5 = vmul.f32 %v1819_v57, %v1723_v21 }
 0x5a6   : > { %v2331_v38 = vpop.eup %2330  ;;  %v1763_v19 = vmul.f32 0.70710677, %v3732_v24  ;;  %2206 = vmatprep.subr.bf16.mxu1 %v2205_v35  ;;  %v1852_v11 = vmul.f32 %v1820_v53, %v1724_v47  ;;  %v1731_v21 = vmul.f32 0.5, %v3732_v24 }
 0x5a7   : > { %v2333_v1 = vpop.eup %2332  ;;  %v1821_v40 = vadd.f32 1.0, %v2331_v38  ;;  %v1764_v23 = vmul.f32 0.70710677, %v3734_v46  ;;  %v1690_v49 = vpop.f32.mrb[26].mxu0  ;;  %2208 = vmatpush1.bf16.msra.mxu1 %v2207_v63 }
 0x5a8   : > { %v1822_v29 = vadd.f32 1.0, %v2333_v1  ;;  %2342 = verf.f32 %v1763_v19  ;;  %v1691_v45 = vadd.f32 %v1690_v49, %v1486_v9  ;;  %v1692_v22 = vpop.f32.mrb[27].mxu0  ;;  %v1732_v1 = vmul.f32 0.5, %v3734_v46 }
 0x5a9   : > { %v1853_v48 = vmul.f32 %v1821_v40, %v1725_v17  ;;  %2344 = verf.f32 %v1764_v23  ;;  %v1693_v13 = vadd.f32 %v1692_v22, %v1486_v9 }
 0x5aa   : > { %v2335_v52 = vpop.eup %2334  ;;  %v1854_v33 = vmul.f32 %v1822_v29, %v1726_v18  ;;  %v1765_v20 = vmul.f32 0.70710677, %v1691_v45  ;;  %v1733_v53 = vmul.f32 0.5, %v1691_v45 }
 0x5ab   : > { %v2337_v56 = vpop.eup %2336  ;;  %v2211_v7 = vpack.c.bf16 %v1853_v48, %v1851_v5  ;;  %v1766_v50 = vmul.f32 0.70710677, %v1693_v13  ;;  %v1696_v10 = vpop.f32.mrb[28].mxu0  ;;  %v1823_v54 = vadd.f32 1.0, %v2335_v52  ;;  %v1734_v9 = vmul.f32 0.5, %v1693_v13 }
 0x5ac   : > { %2346 = verf.f32 %v1765_v20  ;;  %v1697_v28 = vadd.f32 %v1696_v10, %v1491_v34  ;;  %v1698_v8 = vpop.f32.mrb[29].mxu0  ;;  %v2209_v58 = vpack.c.bf16 %v1854_v33, %v1852_v11  ;;  %v1824_v3 = vadd.f32 1.0, %v2337_v56 }
 0x5ad   : > { %2348 = verf.f32 %v1766_v50  ;;  %v1699_v43 = vadd.f32 %v1698_v8, %v1491_v34  ;;  %v1855_v41 = vmul.f32 %v1823_v54, %v1727_v27  ;;  %v1867_v54 = vld [vmem:[%s3842_s7] sm:$0xff]  ;;  %v1878_v27 = vpop.permute.xlu0 %1877 }
 0x5ae   : > { %v2339_v51 = vpop.eup %2338  ;;  %v1767_v25 = vmul.f32 0.70710677, %v1697_v28  ;;  %2210 = vmatprep.subr.bf16.mxu1 %v2209_v58  ;;  %v1856_v36 = vmul.f32 %v1824_v3, %v1728_v32  ;;  %v1735_v45 = vmul.f32 0.5, %v1697_v28  ;;  %v1868_v28 = vld [vmem:[%s3842_s7 + $0x8] sm:$0xff]  ;;  %v2358_v32 = vld [vmem:[%s2639_s19] sm:$0xff] }
 0x5af   : > { %v2341_v39 = vpop.eup %2340  ;;  %v1825_v14 = vadd.f32 1.0, %v2339_v51  ;;  %v1768_v26 = vmul.f32 0.70710677, %v1699_v43  ;;  %v1702_v0 = vpop.f32.mrb[30].mxu0  ;;  %2212 = vmatpush1.bf16.msra.mxu1 %v2211_v7  ;;  %v1736_v46 = vmul.f32 0.5, %v1699_v43  ;;  %v1869_v43 = vld [vmem:[%s3842_s7 + $0x10] sm:$0xff] }
 0x5b0   : > { %v1826_v4 = vadd.f32 1.0, %v2341_v39  ;;  %2350 = verf.f32 %v1767_v25  ;;  %v1703_v37 = vadd.f32 %v1702_v0, %v1496_v62  ;;  %v1704_v42 = vpop.f32.mrb[31].mxu0  ;;  %v1870_v51 = vld [vmem:[%s3842_s7 + $0x18] sm:$0xff] }
 0x5b1   : > { %v1857_v6 = vmul.f32 %v1825_v14, %v1729_v31  ;;  %2352 = verf.f32 %v1768_v26  ;;  %v1705_v59 = vadd.f32 %v1704_v42, %v1496_v62  ;;  %v1883_v14 = vpop.permute.xlu1 %1882  ;;  %v2359_v26 = vld [vmem:[%s2639_s19 + $0x8] sm:$0xff]  ;;  %v2360_v42 = vld [vmem:[%s2639_s19 + $0x10] sm:$0xff] }
 0x5b2   : > { %v2343_v30 = vpop.eup %2342  ;;  %v1858_v63 = vmul.f32 %v1826_v4, %v1730_v44  ;;  %v1769_v12 = vmul.f32 0.70710677, %v1703_v37  ;;  %v1737_v33 = vmul.f32 0.5, %v1703_v37 }
 0x5b3   : > { %v2345_v60 = vpop.eup %2344  ;;  %v2215_v2 = vpack.c.bf16 %v1857_v6, %v1855_v41  ;;  %v1770_v16 = vmul.f32 0.70710677, %v1705_v59  ;;  %v1827_v35 = vadd.f32 1.0, %v2343_v30  ;;  %v1738_v13 = vmul.f32 0.5, %v1705_v59  ;;  %v1888_v6 = vpop.permute.xlu0 %1887  ;;  %v2361_v59 = vld [vmem:[%s2639_s19 + $0x18] sm:$0xff] }
 0x5b4   : > { %2354 = verf.f32 %v1769_v12  ;;  %v2213_v15 = vpack.c.bf16 %v1858_v63, %v1856_v36  ;;  %v1828_v57 = vadd.f32 1.0, %v2345_v60 }
 0x5b5   : > { %2356 = verf.f32 %v1770_v16  ;;  %v1859_v17 = vmul.f32 %v1827_v35, %v1731_v21  ;;  %v2363_v35 = vld [vmem:[%s2639_s19 + $0x28] sm:$0xff] }
 0x5b6   : > { %v2347_v61 = vpop.eup %2346  ;;  %2214 = vmatprep.subr.bf16.mxu1 %v2213_v15  ;;  %v1860_v49 = vmul.f32 %v1828_v57, %v1732_v1  ;;  %v1893_v15 = vpop.permute.xlu1 %1892 }
 0x5b7   : > { %v2349_v38 = vpop.eup %2348  ;;  %v1829_v19 = vadd.f32 1.0, %v2347_v61  ;;  %2216 = vmatpush1.bf16.msra.mxu1 %v2215_v2  ;;  %v2362_v2 = vld [vmem:[%s2639_s19 + $0x20] sm:$0xff] }
 0x5b8   : > { %v1830_v47 = vadd.f32 1.0, %v2349_v38 }
 0x5b9   : > { %v1861_v40 = vmul.f32 %v1829_v19, %v1733_v53  ;;  %v2364_v19 = vld [vmem:[%s2639_s19 + $0x30] sm:$0xff] }
 0x5ba   : > { %v2351_v23 = vpop.eup %2350  ;;  %v1862_v18 = vmul.f32 %v1830_v47, %v1734_v9  ;;  %v2365_v9 = vld [vmem:[%s2639_s19 + $0x38] sm:$0xff] }
 0x5bb   : > { %v2353_v29 = vpop.eup %2352  ;;  %v2219_v22 = vpack.c.bf16 %v1861_v40, %v1859_v17  ;;  %v1831_v48 = vadd.f32 1.0, %v2351_v23 }
 0x5bc   : > { %v2217_v5 = vpack.c.bf16 %v1862_v18, %v1860_v49  ;;  %v1832_v11 = vadd.f32 1.0, %v2353_v29 }
 0x5bd   : > { %v1863_v34 = vmul.f32 %v1831_v48, %v1735_v45 }
 0x5be   : > { %v2355_v52 = vpop.eup %2354  ;;  %2218 = vmatprep.subr.bf16.mxu1 %v2217_v5  ;;  %v1864_v50 = vmul.f32 %v1832_v11, %v1736_v46 }
 0x5bf   : > { %v2357_v24 = vpop.eup %2356  ;;  %v1833_v20 = vadd.f32 1.0, %v2355_v52  ;;  %2220 = vmatpush1.bf16.msra.mxu1 %v2219_v22 }
 0x5c0   : > { %v1834_v56 = vadd.f32 1.0, %v2357_v24 }
 0x5c1   : > { %v1865_v7 = vmul.f32 %v1833_v20, %v1737_v33 }
 0x5c2   : > { %v1866_v10 = vmul.f32 %v1834_v56, %v1738_v13 }
 0x5c3   : > { %v2223_v8 = vpack.c.bf16 %v1865_v7, %v1863_v34 }
 0x5c4   : > { %v2221_v58 = vpack.c.bf16 %v1866_v10, %v1864_v50 }
 0x5c6   : > { %2222 = vmatprep.subr.bf16.mxu1 %v2221_v58 }
 0x5c7   : > { %2224 = vmatpush1.bf16.msra.mxu1 %v2223_v8 }
 0x5ca   : > { %1960 = vmatmul.mubr.f32.vlgmr.msra.gmra.mrb[16].mxu1 %v1867_v54 }
 0x5cb   : > { %1965 = vmatprep.mubr.f32.mxu1 %v3925_v55 }
 0x5ce   : > { %1966 = vmatmul.mubr.f32.gmra.mrb[18].mxu1 %v1868_v28 }
 0x5cf   : > { %1971 = vmatprep.mubr.f32.mxu1 %v3925_v55 }
 0x5d2   : > { %1972 = vmatmul.mubr.f32.gmra.mrb[20].mxu1 %v1869_v43 }
 0x5d3   : > { %1977 = vmatprep.mubr.f32.mxu1 %v3925_v55 }
 0x5d6   : > { %1978 = vmatmul.mubr.f32.gmra.mrb[22].mxu1 %v1870_v51 }
 0x69d   : > { %v1961_v3 = vpop.f32.mrb[16].mxu1 }
 0x69e   : > { %v1962_v25 = vadd.f32 %v1961_v3, %v1878_v27  ;;  %v1963_v39 = vpop.f32.mrb[17].mxu1 }
 0x69f   : > { %v1964_v62 = vadd.f32 %v1963_v39, %v1878_v27 }
 0x6a0   : > { %v1984_v31 = vadd.f32 %v2358_v32, %v1962_v25 }
 0x6a1   : > { %v1985_v0 = vadd.f32 %v2359_v26, %v1964_v62  ;;  %v1967_v44 = vpop.f32.mrb[18].mxu1 }
 0x6a2   : > { %1992 = vst [vmem:[%s3767_s20] sm:$0xff] %v1984_v31  ;;  %v1968_v55 = vadd.f32 %v1967_v44, %v1883_v14  ;;  %v1969_v4 = vpop.f32.mrb[19].mxu1 }
 0x6a3   : > { %1993 = vst [vmem:[%s3767_s20 + $0x8] sm:$0xff] %v1985_v0  ;;  %v1970_v37 = vadd.f32 %v1969_v4, %v1883_v14 }
 0x6a4   : > { %v1986_v41 = vadd.f32 %v2360_v42, %v1968_v55 }
 0x6a5   : > { %v1987_v30 = vadd.f32 %v2361_v59, %v1970_v37  ;;  %v1973_v36 = vpop.f32.mrb[20].mxu1 }
 0x6a6   : > { %1994 = vst [vmem:[%s3767_s20 + $0x10] sm:$0xff] %v1986_v41  ;;  %v1974_v63 = vadd.f32 %v1973_v36, %v1888_v6  ;;  %v1975_v12 = vpop.f32.mrb[21].mxu1 }
 0x6a7   : > { %1995 = vst [vmem:[%s3767_s20 + $0x18] sm:$0xff] %v1987_v30  ;;  %v1976_v60 = vadd.f32 %v1975_v12, %v1888_v6 }
 0x6a8   : > { %v1988_v16 = vadd.f32 %v2362_v2, %v1974_v63 }
 0x6a9   : > { %v1989_v61 = vadd.f32 %v2363_v35, %v1976_v60  ;;  %v1979_v57 = vpop.f32.mrb[22].mxu1 }
 0x6aa   : > { %1996 = vst [vmem:[%s3767_s20 + $0x20] sm:$0xff] %v1988_v16  ;;  %v1980_v38 = vadd.f32 %v1979_v57, %v1893_v15  ;;  %v1981_v21 = vpop.f32.mrb[23].mxu1 }
 0x6ab   : > { %1997 = vst [vmem:[%s3767_s20 + $0x28] sm:$0xff] %v1989_v61  ;;  %v1982_v53 = vadd.f32 %v1981_v21, %v1893_v15 }
 0x6ac   : > { %v1990_v1 = vadd.f32 %v2364_v19, %v1980_v38 }
 0x6ad   : > { %v1991_v47 = vadd.f32 %v2365_v9, %v1982_v53 }
 0x6ae   : > { %1998 = vst [vmem:[%s3767_s20 + $0x30] sm:$0xff] %v1990_v1 }
 0x6af   : > { %1999 = vst [vmem:[%s3767_s20 + $0x38] sm:$0xff] %v1991_v47 }
 0x6b0   : > { %2409 = shalt.err (!%p2406_p2)
}
 0x6b1   : > { %s2410_s19 = scalar_lea.hbm %s3788_s24, 1024  ;;  %s2414_s14 = scalar_lea.hbm %s3844_s9, 2048 }
 0x6b2   : > { %p2411_p4 = scmp.ne.s32.totalorder %s3788_s24, %s2410_s19  ;;  %p2415_p9 = scmp.lt.u32.totalorder %s3788_s24, %s3844_s9 }
 0x6b3   : > { %p2416_p1 = scmp.lt.u32.totalorder %s2414_s14, %s2410_s19  ;;  %p2418_p6 = scmp.lt.u32.totalorder %s2410_s19, %s3788_s24 }
 0x6b4   : > { %p2412_p5 = pnand %p2411_p4, %p3927_p11 }
 0x6b5   : > { %p2417_p3 = por %p2416_p1, %p2415_p9 }
 0x6b6   : > { %p2413_p7 = pneg %p2412_p5 }
 0x6b7   : > { %p2419_p12 = por %p2418_p6, %p2417_p3 }
 0x6b9   : > { %p2420_p13 = pnand %p2419_p12, %p2413_p7 }
 0x6bb   : > { %2423 = shalt.err (!%p2420_p13)
}
 0x6bc   : > { %s2478_s13 = smov 256  }
 0x6bd   : > { %2227 = dma.vmem_to_hbm [thread:$0]  (%p3927_p11), %s3781_s17, 1024, %s3788_s24, %s2001_s25, %s2478_s13, %s2478_s13, %s3887_s16  }
 0x6be PF: > { %s2030_s23 = sand.u32 1, %s2450_s30   ;;  %p3928_p8 = scmp.ne.s32.totalorder %s3879_s22, 0 }
 0x6bf   : > { %p3929_p10 = scmp.ge.s32.totalorder %s2462_s12, 2  ;;  %s2031_s27 = scalar_lea.sflag [#allocation4], %s2030_s23 }
 0x6c1   : > { %p2234_p0 = pnand %p3929_p10, %p3928_p8 }
 0x6c3   : > { %2445 = dma.done.wait (!%p2234_p0), %s2031_s27, 1024  }
 0x6c4   : > { %2447 = vsyncadd (!%p2234_p0), %s2031_s27, 4294966272  ;;  %p22_p2 = scmp.ge.s32.totalorder %s2554_s15, 4   ;;  %s3930_s30 = smov %s2454_s10 }
 0x6c5   : > { %s3931_s10 = smov %s2458_s11  ;;  %s3932_s11 = smov %s2566_s18 }
 0x6c6   : > { %s3933_s12 = smov %s2554_s15  ;;  %24 = sbr.rel (!%p22_p2) target bundleno = 7 (0x7), region = 110 }
 0x6cd   :  { %2036 = vsyncpa [#allocation3], 1 }
 0x6ce   :  { %2038 = vsyncpa [#allocation3 + $0x1], 1 }
 0x6cf   :  { %2039 = vsyncpa [#allocation4], 1 }
 0x6d0   :  { %2041 = vsyncpa [#allocation4 + $0x1], 1 }

</bundles_post_ra>
